<compile_context>
chip_gen: v5e
topology: v5e:2x2
jax: 0.10.0
libtpu: 0.0.40
codegen_flags: <defaults>
</compile_context>

<pallas_src>
import functools

import jax
import jax.numpy as jnp
from jax.experimental import pallas as pl
from jax.experimental.pallas import tpu as pltpu

H = 32          # hidden_size
STEP = 4
L = 2           # encoder_layer
HD = H // STEP  # decoder mid width
H2 = 2 * H      # 64
H3 = 3 * H      # 96
WF = H3 + H + H3  # 224 fused-RHS lane width


def model_kernel(B, S, x_ref, slab_ref, w_ref, out_ref):
    """Gridless forward.  All refs are whole-array VMEM.

    x_ref    : [S*B, 1]  seq-major flattened scalar input per (t, b), f32
    slab_ref : [8, 128]  f32 constants slab:
                 row 0, lanes 0:96  = u0   (folded embedding->layer-0 gi weight)
                 row 1, lanes 0:96  = c0   (folded embedding->layer-0 gi bias)
                 row 2, lanes 0:32  = v0, 32:64 = v1, lane 64 = cdec (decoder fold)
    w_ref    : [2H, 224] bf16 fused GRU RHS (layout documented above)
    out_ref  : [B, 1]
    """
    f32 = jnp.float32
    bf16 = jnp.bfloat16

    u0 = slab_ref[0:1, 0:H3]          # [1, 96]
    c0 = slab_ref[1:2, 0:H3]          # [1, 96]
    v01 = slab_ref[2:3, 0:H2]         # [1, 64]  (v0 | v1)
    cdec = slab_ref[2:3, H2:H2 + 1]   # [1, 1]

    # Embedding + all layer-0 input-gate matmuls, folded to one broadcast
    # multiply-add (off the serial chain):  gi0_all[t*B+b] = x[b,t]*u0 + c0
    gi0_all = x_ref[...] * u0 + c0    # [S*B, 3H]

    w = w_ref[...]                    # [2H, 224] bf16 (stays in vregs)

    h0 = jnp.zeros((B, H), f32)
    h1 = jnp.zeros((B, H), f32)
    gh0 = jnp.zeros((B, H3), f32)     # layer-0 recurrent pre-acts; h0(0)=0 -> 0

    # 2-layer GRU over time (static unroll, S is tiny).  Per step: one bf16
    # MXU matmul + two cheap cells; gate slices sit at lane offsets 0/64/96/128.
    for t in range(S):
        gi0 = gi0_all[t * B:(t + 1) * B, :]            # static sublane slice
        # --- layer-0 cell (gh0 carried from previous step's fused matmul) ---
        rz0 = jax.nn.sigmoid(gi0[:, :H2] + gh0[:, :H2])
        r0 = rz0[:, :H]
        z0 = rz0[:, H:]
        n0 = jnp.tanh(gi0[:, H2:] + r0 * gh0[:, H2:])
        h0 = (1.0 - z0) * n0 + z0 * h0
        # --- single fused matmul: layer-1 gates + next-step layer-0 gh0 ---
        hh = jnp.concatenate([h0, h1], axis=1).astype(bf16)       # [B, 2H]
        fused = jnp.dot(hh, w, preferred_element_type=f32)        # [B, 224]
        # --- layer-1 cell (rz pre-activations already summed in the RHS) ---
        rz1 = jax.nn.sigmoid(fused[:, :H2])
        r1 = rz1[:, :H]
        z1 = rz1[:, H:]
        n1 = jnp.tanh(fused[:, H2:H3] + r1 * fused[:, H3:H3 + H])
        h1 = (1.0 - z1) * n1 + z1 * h1
        # carry layer-0 recurrent pre-activations for step t+1
        gh0 = fused[:, H3 + H:]                                    # lanes 128:224

    # Decoder (3 activation-free Linears on concat([h0, h1])) folded into a
    # single elementwise multiply + one lane reduction.
    d = jnp.sum(h0 * v01[:, :H] + h1 * v01[:, H:], axis=1, keepdims=True)
    out_ref[...] = d + cdec


def fold_params(p):
    """Trace-time algebraic folds + weight repacking (runs once, not per call).
    Valid because fc_embedding/decoder are activation-free and the GRU is
    bias=False with PyTorch (r, z, n) gate order."""
    f32 = jnp.float32

    # fc_embedding fold: emb = x * w_eff + b_eff
    w_eff = p["we0"] @ p["we1"] @ p["we2"]                                   # [1, H]
    b_eff = p["be0"] @ p["we1"] @ p["we2"] + p["be1"] @ p["we2"] + p["be2"]  # [1, H]

    def stack(w):                     # w: [3, H, H] (gate r|z|n, in, out)
        return jnp.concatenate([w[0], w[1], w[2]], axis=1)                  # [H, 3H]

    wih0_g = stack(p["wih0"])
    whh0_g = stack(p["whh0"])
    wih1_g = stack(p["wih1"])
    whh1_g = stack(p["whh1"])

    # fold embedding into the layer-0 input-gate affine:
    #   gi0 = emb @ wih0_g = x * (w_eff @ wih0_g) + (b_eff @ wih0_g)
    u0 = w_eff @ wih0_g                                                      # [1, 3H]
    c0 = b_eff @ wih0_g                                                      # [1, 3H]

    # fused GRU RHS [2H, 224]:
    #   rows 0:H  multiply h0_new, rows H:2H multiply h1
    #   lanes  0: 64 -> (gi1 + gh1)_rz    (wih1_rz over h0, whh1_rz over h1)
    #   lanes 64: 96 -> gi1_n             (wih1_n over h0)
    #   lanes 96:128 -> gh1_n             (whh1_n over h1)
    #   lanes 128:224-> gh0(t+1)          (whh0_g over h0)
    zH = jnp.zeros((H, H), f32)
    z3H = jnp.zeros((H, H3), f32)
    top = jnp.concatenate([wih1_g[:, :H2], wih1_g[:, H2:], zH, whh0_g], axis=1)
    bot = jnp.concatenate([whh1_g[:, :H2], zH, whh1_g[:, H2:], z3H], axis=1)
    w_fused = jnp.concatenate([top, bot], axis=0).astype(jnp.bfloat16)       # [2H, 224]

    # decoder fold: out = sum(h0*v0 + h1*v1, -1) + cdec
    wd2_col = p["wd2"].T                                                     # [HD, 1]
    v0 = (p["wd0"][0] @ p["wd1"] @ wd2_col).T                                # [1, H]
    v1 = (p["wd0"][1] @ p["wd1"] @ wd2_col).T                                # [1, H]
    cdec = (p["bd0"] @ p["wd1"] + p["bd1"]) @ wd2_col + p["bd2"]             # [1, 1]

    # pack the small constants into one lane-dense [8, 128] slab (single DMA)
    slab = jnp.zeros((8, 128), f32)
    slab = slab.at[0, :H3].set(u0[0])
    slab = slab.at[1, :H3].set(c0[0])
    slab = slab.at[2, :H].set(v0[0])
    slab = slab.at[2, H:H2].set(v1[0])
    slab = slab.at[2, H2].set(cdec[0, 0])

    return dict(slab=slab, w=w_fused)


def model_forward(x, fp):
    """x: [B, S] float32, fp: folded params  ->  [B] float32."""
    B, S = x.shape
    # seq-major flatten so GRU time step t is the contiguous row block
    # [t*B, (t+1)*B).  ([S*B, 1] is lane-sparse but only S*B elements total.)
    x_flat = jnp.transpose(x, (1, 0)).reshape(S * B, 1).astype(jnp.float32)
    args = (x_flat, fp["slab"], fp["w"])
    out = pl.pallas_call(
        functools.partial(model_kernel, B, S),
        out_shape=jax.ShapeDtypeStruct((B, 1), jnp.float32),
        in_specs=[pl.BlockSpec(memory_space=pltpu.MemorySpace.VMEM)
                  for _ in args],
        out_specs=pl.BlockSpec(memory_space=pltpu.MemorySpace.VMEM),
    )(*args)
    return out[:, 0]                                    # squeeze(1)


def init_params(key):
    """Deterministic synthetic parameters (shapes from Model.__init__,
    hidden_size=32, step=4, encoder_layer=2, is_bidir=False).  All weights
    stored as [in_features, out_features]."""
    ks = jax.random.split(key, 16)

    def w(k, shape, scale=0.1):
        return (scale * jax.random.normal(k, shape)).astype(jnp.float32)

    return dict(
        # fc_embedding
        we0=w(ks[0], (1, 4)),    be0=w(ks[1], (1, 4)),
        we1=w(ks[2], (4, 16)),   be1=w(ks[3], (1, 16)),
        we2=w(ks[4], (16, H)),   be2=w(ks[5], (1, H)),
        # GRU (bias=False); gate-stacked [3(r,z,n), in, out]
        wih0=w(ks[6], (3, H, H)), whh0=w(ks[7], (3, H, H)),
        wih1=w(ks[8], (3, H, H)), whh1=w(ks[9], (3, H, H)),
        # decoder: first Linear(2H, H) split per-layer-state -> [2, H, H]
        wd0=w(ks[10], (2, H, H)), bd0=w(ks[11], (1, H)),
        wd1=w(ks[12], (H, HD)),   bd1=w(ks[13], (1, HD)),
        wd2=w(ks[14], (1, HD)),   bd2=w(ks[15], (1, 1)),
    )


def reference_forward(x, p):
    """Plain-JAX f32 reference of the unfolded per-layer math (sanity check)."""
    xr = x[..., None].astype(jnp.float32)               # [B, S, 1]
    e = xr @ p["we0"] + p["be0"]
    e = e @ p["we1"] + p["be1"]
    emb = e @ p["we2"] + p["be2"]                       # [B, S, H]

    def cell(x_t, h, wih, whh):
        r = jax.nn.sigmoid(x_t @ wih[0] + h @ whh[0])
        z = jax.nn.sigmoid(x_t @ wih[1] + h @ whh[1])
        n = jnp.tanh(x_t @ wih[2] + r * (h @ whh[2]))
        return (1.0 - z) * n + z * h

    B, S = x.shape
    h0 = jnp.zeros((B, H), jnp.float32)
    h1 = jnp.zeros((B, H), jnp.float32)
    for t in range(S):
        h0 = cell(emb[:, t, :], h0, p["wih0"], p["whh0"])
        h1 = cell(h0, h1, p["wih1"], p["whh1"])
    d = h0 @ p["wd0"][0] + h1 @ p["wd0"][1] + p["bd0"]
    d = d @ p["wd1"] + p["bd1"]
    return jnp.sum(d * p["wd2"], axis=1) + p["bd2"][0, 0]


if __name__ == "__main__":
    key = jax.random.PRNGKey(0)
    k_param, k_x = jax.random.split(key)
    params = init_params(k_param)
    folded = jax.tree_util.tree_map(jax.block_until_ready, fold_params(params))

    B, S = 8, 8                       # batch=8 (sublane-aligned), seq=8
    x = jax.random.normal(k_x, (B, S), dtype=jnp.float32)

    out = jax.block_until_ready(model_forward(x, folded))
    ref = jax.block_until_ready(reference_forward(x, params))

    assert out.shape == (B,), out.shape
    # Tolerance loosened vs. the pure-f32 version because the fused GRU matmul
    # uses bf16 MXU operands (f32 accumulation, f32 cell math).
    assert jnp.allclose(out, ref, rtol=2e-3, atol=2e-3), (out, ref)
    print("KERNEL_OK")
</pallas_src>

<mosaic_0001>
module attributes {stable_mosaic.version = 11 : i64} {
  func.func @model_kernel(%arg0: memref<64x1xf32, #tpu.memory_space<vmem>>, %arg1: memref<8x128xf32, #tpu.memory_space<vmem>>, %arg2: memref<64x224xbf16, #tpu.memory_space<vmem>>, %arg3: memref<8x1xf32, #tpu.memory_space<vmem>>) attributes {dimension_semantics = [], scalar_prefetch = 0 : i64, scratch_operands = 0 : i64, tpu.core_type = #tpu.core_type<tc>} {
    %c0 = arith.constant 0 : index
    %c0_0 = arith.constant 0 : index
    %0 = vector.load %arg1[%c0, %c0_0] : memref<8x128xf32, #tpu.memory_space<vmem>>, vector<1x96xf32>
    %c1 = arith.constant 1 : index
    %c0_1 = arith.constant 0 : index
    %1 = vector.load %arg1[%c1, %c0_1] : memref<8x128xf32, #tpu.memory_space<vmem>>, vector<1x96xf32>
    %c2 = arith.constant 2 : index
    %c0_2 = arith.constant 0 : index
    %2 = vector.load %arg1[%c2, %c0_2] : memref<8x128xf32, #tpu.memory_space<vmem>>, vector<1x64xf32>
    %c2_3 = arith.constant 2 : index
    %c64 = arith.constant 64 : index
    %3 = vector.load %arg1[%c2_3, %c64] : memref<8x128xf32, #tpu.memory_space<vmem>>, vector<1x1xf32>
    %c0_4 = arith.constant 0 : index
    %c0_5 = arith.constant 0 : index
    %4 = vector.load %arg0[%c0_4, %c0_5] : memref<64x1xf32, #tpu.memory_space<vmem>>, vector<64x1xf32>
    %5 = vector.broadcast %4 : vector<64x1xf32> to vector<64x96xf32>
    %6 = vector.broadcast %0 : vector<1x96xf32> to vector<64x96xf32>
    %7 = arith.mulf %5, %6 : vector<64x96xf32>
    %8 = vector.broadcast %1 : vector<1x96xf32> to vector<64x96xf32>
    %9 = arith.addf %7, %8 : vector<64x96xf32>
    %c0_6 = arith.constant 0 : index
    %c0_7 = arith.constant 0 : index
    %10 = vector.load %arg2[%c0_6, %c0_7] : memref<64x224xbf16, #tpu.memory_space<vmem>>, vector<64x224xbf16>
    %cst = arith.constant 0.000000e+00 : f32
    %11 = vector.broadcast %cst : f32 to vector<8x32xf32>
    %cst_8 = arith.constant 0.000000e+00 : f32
    %12 = vector.broadcast %cst_8 : f32 to vector<8x32xf32>
    %cst_9 = arith.constant 0.000000e+00 : f32
    %13 = vector.broadcast %cst_9 : f32 to vector<8x96xf32>
    %14 = vector.extract_strided_slice %9 {offsets = [0, 0], sizes = [8, 96], strides = [1, 1]} : vector<64x96xf32> to vector<8x96xf32>
    %15 = vector.extract_strided_slice %14 {offsets = [0, 0], sizes = [8, 64], strides = [1, 1]} : vector<8x96xf32> to vector<8x64xf32>
    %16 = vector.extract_strided_slice %13 {offsets = [0, 0], sizes = [8, 64], strides = [1, 1]} : vector<8x96xf32> to vector<8x64xf32>
    %17 = arith.addf %15, %16 : vector<8x64xf32>
    %18 = arith.negf %17 : vector<8x64xf32>
    %19 = math.exp %18 : vector<8x64xf32>
    %cst_10 = arith.constant 1.000000e+00 : f32
    %20 = vector.broadcast %cst_10 : f32 to vector<8x64xf32>
    %21 = arith.addf %20, %19 : vector<8x64xf32>
    %22 = arith.divf %20, %21 : vector<8x64xf32>
    %23 = vector.extract_strided_slice %22 {offsets = [0, 0], sizes = [8, 32], strides = [1, 1]} : vector<8x64xf32> to vector<8x32xf32>
    %24 = vector.extract_strided_slice %22 {offsets = [0, 32], sizes = [8, 32], strides = [1, 1]} : vector<8x64xf32> to vector<8x32xf32>
    %25 = vector.extract_strided_slice %14 {offsets = [0, 64], sizes = [8, 32], strides = [1, 1]} : vector<8x96xf32> to vector<8x32xf32>
    %26 = vector.extract_strided_slice %13 {offsets = [0, 64], sizes = [8, 32], strides = [1, 1]} : vector<8x96xf32> to vector<8x32xf32>
    %27 = arith.mulf %23, %26 : vector<8x32xf32>
    %28 = arith.addf %25, %27 : vector<8x32xf32>
    %29 = math.tanh %28 : vector<8x32xf32>
    %cst_11 = arith.constant 1.000000e+00 : f32
    %30 = vector.broadcast %cst_11 : f32 to vector<8x32xf32>
    %31 = arith.subf %30, %24 : vector<8x32xf32>
    %32 = arith.mulf %31, %29 : vector<8x32xf32>
    %33 = arith.mulf %24, %11 : vector<8x32xf32>
    %34 = arith.addf %32, %33 : vector<8x32xf32>
    %35 = tpu.concatenate %34, %12 in 1 : vector<8x32xf32>, vector<8x32xf32> -> vector<8x64xf32>
    %36 = arith.truncf %35 : vector<8x64xf32> to vector<8x64xbf16>
    %cst_12 = arith.constant dense<0.000000e+00> : vector<8x224xf32>
    %37 = tpu.matmul %36, %10, %cst_12 {dimension_numbers = #tpu.dot_dimension_numbers<[1], [0], [0], [1], [0, 0, 1, 1], [], []>} : vector<8x64xbf16>, vector<64x224xbf16>, vector<8x224xf32> -> vector<8x224xf32>
    %38 = vector.extract_strided_slice %37 {offsets = [0, 0], sizes = [8, 64], strides = [1, 1]} : vector<8x224xf32> to vector<8x64xf32>
    %39 = arith.negf %38 : vector<8x64xf32>
    %40 = math.exp %39 : vector<8x64xf32>
    %cst_13 = arith.constant 1.000000e+00 : f32
    %41 = vector.broadcast %cst_13 : f32 to vector<8x64xf32>
    %42 = arith.addf %41, %40 : vector<8x64xf32>
    %43 = arith.divf %41, %42 : vector<8x64xf32>
    %44 = vector.extract_strided_slice %43 {offsets = [0, 0], sizes = [8, 32], strides = [1, 1]} : vector<8x64xf32> to vector<8x32xf32>
    %45 = vector.extract_strided_slice %43 {offsets = [0, 32], sizes = [8, 32], strides = [1, 1]} : vector<8x64xf32> to vector<8x32xf32>
    %46 = vector.extract_strided_slice %37 {offsets = [0, 64], sizes = [8, 32], strides = [1, 1]} : vector<8x224xf32> to vector<8x32xf32>
    %47 = vector.extract_strided_slice %37 {offsets = [0, 96], sizes = [8, 32], strides = [1, 1]} : vector<8x224xf32> to vector<8x32xf32>
    %48 = arith.mulf %44, %47 : vector<8x32xf32>
    %49 = arith.addf %46, %48 : vector<8x32xf32>
    %50 = math.tanh %49 : vector<8x32xf32>
    %cst_14 = arith.constant 1.000000e+00 : f32
    %51 = vector.broadcast %cst_14 : f32 to vector<8x32xf32>
    %52 = arith.subf %51, %45 : vector<8x32xf32>
    %53 = arith.mulf %52, %50 : vector<8x32xf32>
    %54 = arith.mulf %45, %12 : vector<8x32xf32>
    %55 = arith.addf %53, %54 : vector<8x32xf32>
    %56 = vector.extract_strided_slice %37 {offsets = [0, 128], sizes = [8, 96], strides = [1, 1]} : vector<8x224xf32> to vector<8x96xf32>
    %57 = vector.extract_strided_slice %9 {offsets = [8, 0], sizes = [8, 96], strides = [1, 1]} : vector<64x96xf32> to vector<8x96xf32>
    %58 = vector.extract_strided_slice %57 {offsets = [0, 0], sizes = [8, 64], strides = [1, 1]} : vector<8x96xf32> to vector<8x64xf32>
    %59 = vector.extract_strided_slice %56 {offsets = [0, 0], sizes = [8, 64], strides = [1, 1]} : vector<8x96xf32> to vector<8x64xf32>
    %60 = arith.addf %58, %59 : vector<8x64xf32>
    %61 = arith.negf %60 : vector<8x64xf32>
    %62 = math.exp %61 : vector<8x64xf32>
    %cst_15 = arith.constant 1.000000e+00 : f32
    %63 = vector.broadcast %cst_15 : f32 to vector<8x64xf32>
    %64 = arith.addf %63, %62 : vector<8x64xf32>
    %65 = arith.divf %63, %64 : vector<8x64xf32>
    %66 = vector.extract_strided_slice %65 {offsets = [0, 0], sizes = [8, 32], strides = [1, 1]} : vector<8x64xf32> to vector<8x32xf32>
    %67 = vector.extract_strided_slice %65 {offsets = [0, 32], sizes = [8, 32], strides = [1, 1]} : vector<8x64xf32> to vector<8x32xf32>
    %68 = vector.extract_strided_slice %57 {offsets = [0, 64], sizes = [8, 32], strides = [1, 1]} : vector<8x96xf32> to vector<8x32xf32>
    %69 = vector.extract_strided_slice %56 {offsets = [0, 64], sizes = [8, 32], strides = [1, 1]} : vector<8x96xf32> to vector<8x32xf32>
    %70 = arith.mulf %66, %69 : vector<8x32xf32>
    %71 = arith.addf %68, %70 : vector<8x32xf32>
    %72 = math.tanh %71 : vector<8x32xf32>
    %cst_16 = arith.constant 1.000000e+00 : f32
    %73 = vector.broadcast %cst_16 : f32 to vector<8x32xf32>
    %74 = arith.subf %73, %67 : vector<8x32xf32>
    %75 = arith.mulf %74, %72 : vector<8x32xf32>
    %76 = arith.mulf %67, %34 : vector<8x32xf32>
    %77 = arith.addf %75, %76 : vector<8x32xf32>
    %78 = tpu.concatenate %77, %55 in 1 : vector<8x32xf32>, vector<8x32xf32> -> vector<8x64xf32>
    %79 = arith.truncf %78 : vector<8x64xf32> to vector<8x64xbf16>
    %cst_17 = arith.constant dense<0.000000e+00> : vector<8x224xf32>
    %80 = tpu.matmul %79, %10, %cst_17 {dimension_numbers = #tpu.dot_dimension_numbers<[1], [0], [0], [1], [0, 0, 1, 1], [], []>} : vector<8x64xbf16>, vector<64x224xbf16>, vector<8x224xf32> -> vector<8x224xf32>
    %81 = vector.extract_strided_slice %80 {offsets = [0, 0], sizes = [8, 64], strides = [1, 1]} : vector<8x224xf32> to vector<8x64xf32>
    %82 = arith.negf %81 : vector<8x64xf32>
    %83 = math.exp %82 : vector<8x64xf32>
    %cst_18 = arith.constant 1.000000e+00 : f32
    %84 = vector.broadcast %cst_18 : f32 to vector<8x64xf32>
    %85 = arith.addf %84, %83 : vector<8x64xf32>
    %86 = arith.divf %84, %85 : vector<8x64xf32>
    %87 = vector.extract_strided_slice %86 {offsets = [0, 0], sizes = [8, 32], strides = [1, 1]} : vector<8x64xf32> to vector<8x32xf32>
    %88 = vector.extract_strided_slice %86 {offsets = [0, 32], sizes = [8, 32], strides = [1, 1]} : vector<8x64xf32> to vector<8x32xf32>
    %89 = vector.extract_strided_slice %80 {offsets = [0, 64], sizes = [8, 32], strides = [1, 1]} : vector<8x224xf32> to vector<8x32xf32>
    %90 = vector.extract_strided_slice %80 {offsets = [0, 96], sizes = [8, 32], strides = [1, 1]} : vector<8x224xf32> to vector<8x32xf32>
    %91 = arith.mulf %87, %90 : vector<8x32xf32>
    %92 = arith.addf %89, %91 : vector<8x32xf32>
    %93 = math.tanh %92 : vector<8x32xf32>
    %cst_19 = arith.constant 1.000000e+00 : f32
    %94 = vector.broadcast %cst_19 : f32 to vector<8x32xf32>
    %95 = arith.subf %94, %88 : vector<8x32xf32>
    %96 = arith.mulf %95, %93 : vector<8x32xf32>
    %97 = arith.mulf %88, %55 : vector<8x32xf32>
    %98 = arith.addf %96, %97 : vector<8x32xf32>
    %99 = vector.extract_strided_slice %80 {offsets = [0, 128], sizes = [8, 96], strides = [1, 1]} : vector<8x224xf32> to vector<8x96xf32>
    %100 = vector.extract_strided_slice %9 {offsets = [16, 0], sizes = [8, 96], strides = [1, 1]} : vector<64x96xf32> to vector<8x96xf32>
    %101 = vector.extract_strided_slice %100 {offsets = [0, 0], sizes = [8, 64], strides = [1, 1]} : vector<8x96xf32> to vector<8x64xf32>
    %102 = vector.extract_strided_slice %99 {offsets = [0, 0], sizes = [8, 64], strides = [1, 1]} : vector<8x96xf32> to vector<8x64xf32>
    %103 = arith.addf %101, %102 : vector<8x64xf32>
    %104 = arith.negf %103 : vector<8x64xf32>
    %105 = math.exp %104 : vector<8x64xf32>
    %cst_20 = arith.constant 1.000000e+00 : f32
    %106 = vector.broadcast %cst_20 : f32 to vector<8x64xf32>
    %107 = arith.addf %106, %105 : vector<8x64xf32>
    %108 = arith.divf %106, %107 : vector<8x64xf32>
    %109 = vector.extract_strided_slice %108 {offsets = [0, 0], sizes = [8, 32], strides = [1, 1]} : vector<8x64xf32> to vector<8x32xf32>
    %110 = vector.extract_strided_slice %108 {offsets = [0, 32], sizes = [8, 32], strides = [1, 1]} : vector<8x64xf32> to vector<8x32xf32>
    %111 = vector.extract_strided_slice %100 {offsets = [0, 64], sizes = [8, 32], strides = [1, 1]} : vector<8x96xf32> to vector<8x32xf32>
    %112 = vector.extract_strided_slice %99 {offsets = [0, 64], sizes = [8, 32], strides = [1, 1]} : vector<8x96xf32> to vector<8x32xf32>
    %113 = arith.mulf %109, %112 : vector<8x32xf32>
    %114 = arith.addf %111, %113 : vector<8x32xf32>
    %115 = math.tanh %114 : vector<8x32xf32>
    %cst_21 = arith.constant 1.000000e+00 : f32
    %116 = vector.broadcast %cst_21 : f32 to vector<8x32xf32>
    %117 = arith.subf %116, %110 : vector<8x32xf32>
    %118 = arith.mulf %117, %115 : vector<8x32xf32>
    %119 = arith.mulf %110, %77 : vector<8x32xf32>
    %120 = arith.addf %118, %119 : vector<8x32xf32>
    %121 = tpu.concatenate %120, %98 in 1 : vector<8x32xf32>, vector<8x32xf32> -> vector<8x64xf32>
    %122 = arith.truncf %121 : vector<8x64xf32> to vector<8x64xbf16>
    %cst_22 = arith.constant dense<0.000000e+00> : vector<8x224xf32>
    %123 = tpu.matmul %122, %10, %cst_22 {dimension_numbers = #tpu.dot_dimension_numbers<[1], [0], [0], [1], [0, 0, 1, 1], [], []>} : vector<8x64xbf16>, vector<64x224xbf16>, vector<8x224xf32> -> vector<8x224xf32>
    %124 = vector.extract_strided_slice %123 {offsets = [0, 0], sizes = [8, 64], strides = [1, 1]} : vector<8x224xf32> to vector<8x64xf32>
    %125 = arith.negf %124 : vector<8x64xf32>
    %126 = math.exp %125 : vector<8x64xf32>
    %cst_23 = arith.constant 1.000000e+00 : f32
    %127 = vector.broadcast %cst_23 : f32 to vector<8x64xf32>
    %128 = arith.addf %127, %126 : vector<8x64xf32>
    %129 = arith.divf %127, %128 : vector<8x64xf32>
    %130 = vector.extract_strided_slice %129 {offsets = [0, 0], sizes = [8, 32], strides = [1, 1]} : vector<8x64xf32> to vector<8x32xf32>
    %131 = vector.extract_strided_slice %129 {offsets = [0, 32], sizes = [8, 32], strides = [1, 1]} : vector<8x64xf32> to vector<8x32xf32>
    %132 = vector.extract_strided_slice %123 {offsets = [0, 64], sizes = [8, 32], strides = [1, 1]} : vector<8x224xf32> to vector<8x32xf32>
    %133 = vector.extract_strided_slice %123 {offsets = [0, 96], sizes = [8, 32], strides = [1, 1]} : vector<8x224xf32> to vector<8x32xf32>
    %134 = arith.mulf %130, %133 : vector<8x32xf32>
    %135 = arith.addf %132, %134 : vector<8x32xf32>
    %136 = math.tanh %135 : vector<8x32xf32>
    %cst_24 = arith.constant 1.000000e+00 : f32
    %137 = vector.broadcast %cst_24 : f32 to vector<8x32xf32>
    %138 = arith.subf %137, %131 : vector<8x32xf32>
    %139 = arith.mulf %138, %136 : vector<8x32xf32>
    %140 = arith.mulf %131, %98 : vector<8x32xf32>
    %141 = arith.addf %139, %140 : vector<8x32xf32>
    %142 = vector.extract_strided_slice %123 {offsets = [0, 128], sizes = [8, 96], strides = [1, 1]} : vector<8x224xf32> to vector<8x96xf32>
    %143 = vector.extract_strided_slice %9 {offsets = [24, 0], sizes = [8, 96], strides = [1, 1]} : vector<64x96xf32> to vector<8x96xf32>
    %144 = vector.extract_strided_slice %143 {offsets = [0, 0], sizes = [8, 64], strides = [1, 1]} : vector<8x96xf32> to vector<8x64xf32>
    %145 = vector.extract_strided_slice %142 {offsets = [0, 0], sizes = [8, 64], strides = [1, 1]} : vector<8x96xf32> to vector<8x64xf32>
    %146 = arith.addf %144, %145 : vector<8x64xf32>
    %147 = arith.negf %146 : vector<8x64xf32>
    %148 = math.exp %147 : vector<8x64xf32>
    %cst_25 = arith.constant 1.000000e+00 : f32
    %149 = vector.broadcast %cst_25 : f32 to vector<8x64xf32>
    %150 = arith.addf %149, %148 : vector<8x64xf32>
    %151 = arith.divf %149, %150 : vector<8x64xf32>
    %152 = vector.extract_strided_slice %151 {offsets = [0, 0], sizes = [8, 32], strides = [1, 1]} : vector<8x64xf32> to vector<8x32xf32>
    %153 = vector.extract_strided_slice %151 {offsets = [0, 32], sizes = [8, 32], strides = [1, 1]} : vector<8x64xf32> to vector<8x32xf32>
    %154 = vector.extract_strided_slice %143 {offsets = [0, 64], sizes = [8, 32], strides = [1, 1]} : vector<8x96xf32> to vector<8x32xf32>
    %155 = vector.extract_strided_slice %142 {offsets = [0, 64], sizes = [8, 32], strides = [1, 1]} : vector<8x96xf32> to vector<8x32xf32>
    %156 = arith.mulf %152, %155 : vector<8x32xf32>
    %157 = arith.addf %154, %156 : vector<8x32xf32>
    %158 = math.tanh %157 : vector<8x32xf32>
    %cst_26 = arith.constant 1.000000e+00 : f32
    %159 = vector.broadcast %cst_26 : f32 to vector<8x32xf32>
    %160 = arith.subf %159, %153 : vector<8x32xf32>
    %161 = arith.mulf %160, %158 : vector<8x32xf32>
    %162 = arith.mulf %153, %120 : vector<8x32xf32>
    %163 = arith.addf %161, %162 : vector<8x32xf32>
    %164 = tpu.concatenate %163, %141 in 1 : vector<8x32xf32>, vector<8x32xf32> -> vector<8x64xf32>
    %165 = arith.truncf %164 : vector<8x64xf32> to vector<8x64xbf16>
    %cst_27 = arith.constant dense<0.000000e+00> : vector<8x224xf32>
    %166 = tpu.matmul %165, %10, %cst_27 {dimension_numbers = #tpu.dot_dimension_numbers<[1], [0], [0], [1], [0, 0, 1, 1], [], []>} : vector<8x64xbf16>, vector<64x224xbf16>, vector<8x224xf32> -> vector<8x224xf32>
    %167 = vector.extract_strided_slice %166 {offsets = [0, 0], sizes = [8, 64], strides = [1, 1]} : vector<8x224xf32> to vector<8x64xf32>
    %168 = arith.negf %167 : vector<8x64xf32>
    %169 = math.exp %168 : vector<8x64xf32>
    %cst_28 = arith.constant 1.000000e+00 : f32
    %170 = vector.broadcast %cst_28 : f32 to vector<8x64xf32>
    %171 = arith.addf %170, %169 : vector<8x64xf32>
    %172 = arith.divf %170, %171 : vector<8x64xf32>
    %173 = vector.extract_strided_slice %172 {offsets = [0, 0], sizes = [8, 32], strides = [1, 1]} : vector<8x64xf32> to vector<8x32xf32>
    %174 = vector.extract_strided_slice %172 {offsets = [0, 32], sizes = [8, 32], strides = [1, 1]} : vector<8x64xf32> to vector<8x32xf32>
    %175 = vector.extract_strided_slice %166 {offsets = [0, 64], sizes = [8, 32], strides = [1, 1]} : vector<8x224xf32> to vector<8x32xf32>
    %176 = vector.extract_strided_slice %166 {offsets = [0, 96], sizes = [8, 32], strides = [1, 1]} : vector<8x224xf32> to vector<8x32xf32>
    %177 = arith.mulf %173, %176 : vector<8x32xf32>
    %178 = arith.addf %175, %177 : vector<8x32xf32>
    %179 = math.tanh %178 : vector<8x32xf32>
    %cst_29 = arith.constant 1.000000e+00 : f32
    %180 = vector.broadcast %cst_29 : f32 to vector<8x32xf32>
    %181 = arith.subf %180, %174 : vector<8x32xf32>
    %182 = arith.mulf %181, %179 : vector<8x32xf32>
    %183 = arith.mulf %174, %141 : vector<8x32xf32>
    %184 = arith.addf %182, %183 : vector<8x32xf32>
    %185 = vector.extract_strided_slice %166 {offsets = [0, 128], sizes = [8, 96], strides = [1, 1]} : vector<8x224xf32> to vector<8x96xf32>
    %186 = vector.extract_strided_slice %9 {offsets = [32, 0], sizes = [8, 96], strides = [1, 1]} : vector<64x96xf32> to vector<8x96xf32>
    %187 = vector.extract_strided_slice %186 {offsets = [0, 0], sizes = [8, 64], strides = [1, 1]} : vector<8x96xf32> to vector<8x64xf32>
    %188 = vector.extract_strided_slice %185 {offsets = [0, 0], sizes = [8, 64], strides = [1, 1]} : vector<8x96xf32> to vector<8x64xf32>
    %189 = arith.addf %187, %188 : vector<8x64xf32>
    %190 = arith.negf %189 : vector<8x64xf32>
    %191 = math.exp %190 : vector<8x64xf32>
    %cst_30 = arith.constant 1.000000e+00 : f32
    %192 = vector.broadcast %cst_30 : f32 to vector<8x64xf32>
    %193 = arith.addf %192, %191 : vector<8x64xf32>
    %194 = arith.divf %192, %193 : vector<8x64xf32>
    %195 = vector.extract_strided_slice %194 {offsets = [0, 0], sizes = [8, 32], strides = [1, 1]} : vector<8x64xf32> to vector<8x32xf32>
    %196 = vector.extract_strided_slice %194 {offsets = [0, 32], sizes = [8, 32], strides = [1, 1]} : vector<8x64xf32> to vector<8x32xf32>
    %197 = vector.extract_strided_slice %186 {offsets = [0, 64], sizes = [8, 32], strides = [1, 1]} : vector<8x96xf32> to vector<8x32xf32>
    %198 = vector.extract_strided_slice %185 {offsets = [0, 64], sizes = [8, 32], strides = [1, 1]} : vector<8x96xf32> to vector<8x32xf32>
    %199 = arith.mulf %195, %198 : vector<8x32xf32>
    %200 = arith.addf %197, %199 : vector<8x32xf32>
    %201 = math.tanh %200 : vector<8x32xf32>
    %cst_31 = arith.constant 1.000000e+00 : f32
    %202 = vector.broadcast %cst_31 : f32 to vector<8x32xf32>
    %203 = arith.subf %202, %196 : vector<8x32xf32>
    %204 = arith.mulf %203, %201 : vector<8x32xf32>
    %205 = arith.mulf %196, %163 : vector<8x32xf32>
    %206 = arith.addf %204, %205 : vector<8x32xf32>
    %207 = tpu.concatenate %206, %184 in 1 : vector<8x32xf32>, vector<8x32xf32> -> vector<8x64xf32>
    %208 = arith.truncf %207 : vector<8x64xf32> to vector<8x64xbf16>
    %cst_32 = arith.constant dense<0.000000e+00> : vector<8x224xf32>
    %209 = tpu.matmul %208, %10, %cst_32 {dimension_numbers = #tpu.dot_dimension_numbers<[1], [0], [0], [1], [0, 0, 1, 1], [], []>} : vector<8x64xbf16>, vector<64x224xbf16>, vector<8x224xf32> -> vector<8x224xf32>
    %210 = vector.extract_strided_slice %209 {offsets = [0, 0], sizes = [8, 64], strides = [1, 1]} : vector<8x224xf32> to vector<8x64xf32>
    %211 = arith.negf %210 : vector<8x64xf32>
    %212 = math.exp %211 : vector<8x64xf32>
    %cst_33 = arith.constant 1.000000e+00 : f32
    %213 = vector.broadcast %cst_33 : f32 to vector<8x64xf32>
    %214 = arith.addf %213, %212 : vector<8x64xf32>
    %215 = arith.divf %213, %214 : vector<8x64xf32>
    %216 = vector.extract_strided_slice %215 {offsets = [0, 0], sizes = [8, 32], strides = [1, 1]} : vector<8x64xf32> to vector<8x32xf32>
    %217 = vector.extract_strided_slice %215 {offsets = [0, 32], sizes = [8, 32], strides = [1, 1]} : vector<8x64xf32> to vector<8x32xf32>
    %218 = vector.extract_strided_slice %209 {offsets = [0, 64], sizes = [8, 32], strides = [1, 1]} : vector<8x224xf32> to vector<8x32xf32>
    %219 = vector.extract_strided_slice %209 {offsets = [0, 96], sizes = [8, 32], strides = [1, 1]} : vector<8x224xf32> to vector<8x32xf32>
    %220 = arith.mulf %216, %219 : vector<8x32xf32>
    %221 = arith.addf %218, %220 : vector<8x32xf32>
    %222 = math.tanh %221 : vector<8x32xf32>
    %cst_34 = arith.constant 1.000000e+00 : f32
    %223 = vector.broadcast %cst_34 : f32 to vector<8x32xf32>
    %224 = arith.subf %223, %217 : vector<8x32xf32>
    %225 = arith.mulf %224, %222 : vector<8x32xf32>
    %226 = arith.mulf %217, %184 : vector<8x32xf32>
    %227 = arith.addf %225, %226 : vector<8x32xf32>
    %228 = vector.extract_strided_slice %209 {offsets = [0, 128], sizes = [8, 96], strides = [1, 1]} : vector<8x224xf32> to vector<8x96xf32>
    %229 = vector.extract_strided_slice %9 {offsets = [40, 0], sizes = [8, 96], strides = [1, 1]} : vector<64x96xf32> to vector<8x96xf32>
    %230 = vector.extract_strided_slice %229 {offsets = [0, 0], sizes = [8, 64], strides = [1, 1]} : vector<8x96xf32> to vector<8x64xf32>
    %231 = vector.extract_strided_slice %228 {offsets = [0, 0], sizes = [8, 64], strides = [1, 1]} : vector<8x96xf32> to vector<8x64xf32>
    %232 = arith.addf %230, %231 : vector<8x64xf32>
    %233 = arith.negf %232 : vector<8x64xf32>
    %234 = math.exp %233 : vector<8x64xf32>
    %cst_35 = arith.constant 1.000000e+00 : f32
    %235 = vector.broadcast %cst_35 : f32 to vector<8x64xf32>
    %236 = arith.addf %235, %234 : vector<8x64xf32>
    %237 = arith.divf %235, %236 : vector<8x64xf32>
    %238 = vector.extract_strided_slice %237 {offsets = [0, 0], sizes = [8, 32], strides = [1, 1]} : vector<8x64xf32> to vector<8x32xf32>
    %239 = vector.extract_strided_slice %237 {offsets = [0, 32], sizes = [8, 32], strides = [1, 1]} : vector<8x64xf32> to vector<8x32xf32>
    %240 = vector.extract_strided_slice %229 {offsets = [0, 64], sizes = [8, 32], strides = [1, 1]} : vector<8x96xf32> to vector<8x32xf32>
    %241 = vector.extract_strided_slice %228 {offsets = [0, 64], sizes = [8, 32], strides = [1, 1]} : vector<8x96xf32> to vector<8x32xf32>
    %242 = arith.mulf %238, %241 : vector<8x32xf32>
    %243 = arith.addf %240, %242 : vector<8x32xf32>
    %244 = math.tanh %243 : vector<8x32xf32>
    %cst_36 = arith.constant 1.000000e+00 : f32
    %245 = vector.broadcast %cst_36 : f32 to vector<8x32xf32>
    %246 = arith.subf %245, %239 : vector<8x32xf32>
    %247 = arith.mulf %246, %244 : vector<8x32xf32>
    %248 = arith.mulf %239, %206 : vector<8x32xf32>
    %249 = arith.addf %247, %248 : vector<8x32xf32>
    %250 = tpu.concatenate %249, %227 in 1 : vector<8x32xf32>, vector<8x32xf32> -> vector<8x64xf32>
    %251 = arith.truncf %250 : vector<8x64xf32> to vector<8x64xbf16>
    %cst_37 = arith.constant dense<0.000000e+00> : vector<8x224xf32>
    %252 = tpu.matmul %251, %10, %cst_37 {dimension_numbers = #tpu.dot_dimension_numbers<[1], [0], [0], [1], [0, 0, 1, 1], [], []>} : vector<8x64xbf16>, vector<64x224xbf16>, vector<8x224xf32> -> vector<8x224xf32>
    %253 = vector.extract_strided_slice %252 {offsets = [0, 0], sizes = [8, 64], strides = [1, 1]} : vector<8x224xf32> to vector<8x64xf32>
    %254 = arith.negf %253 : vector<8x64xf32>
    %255 = math.exp %254 : vector<8x64xf32>
    %cst_38 = arith.constant 1.000000e+00 : f32
    %256 = vector.broadcast %cst_38 : f32 to vector<8x64xf32>
    %257 = arith.addf %256, %255 : vector<8x64xf32>
    %258 = arith.divf %256, %257 : vector<8x64xf32>
    %259 = vector.extract_strided_slice %258 {offsets = [0, 0], sizes = [8, 32], strides = [1, 1]} : vector<8x64xf32> to vector<8x32xf32>
    %260 = vector.extract_strided_slice %258 {offsets = [0, 32], sizes = [8, 32], strides = [1, 1]} : vector<8x64xf32> to vector<8x32xf32>
    %261 = vector.extract_strided_slice %252 {offsets = [0, 64], sizes = [8, 32], strides = [1, 1]} : vector<8x224xf32> to vector<8x32xf32>
    %262 = vector.extract_strided_slice %252 {offsets = [0, 96], sizes = [8, 32], strides = [1, 1]} : vector<8x224xf32> to vector<8x32xf32>
    %263 = arith.mulf %259, %262 : vector<8x32xf32>
    %264 = arith.addf %261, %263 : vector<8x32xf32>
    %265 = math.tanh %264 : vector<8x32xf32>
    %cst_39 = arith.constant 1.000000e+00 : f32
    %266 = vector.broadcast %cst_39 : f32 to vector<8x32xf32>
    %267 = arith.subf %266, %260 : vector<8x32xf32>
    %268 = arith.mulf %267, %265 : vector<8x32xf32>
    %269 = arith.mulf %260, %227 : vector<8x32xf32>
    %270 = arith.addf %268, %269 : vector<8x32xf32>
    %271 = vector.extract_strided_slice %252 {offsets = [0, 128], sizes = [8, 96], strides = [1, 1]} : vector<8x224xf32> to vector<8x96xf32>
    %272 = vector.extract_strided_slice %9 {offsets = [48, 0], sizes = [8, 96], strides = [1, 1]} : vector<64x96xf32> to vector<8x96xf32>
    %273 = vector.extract_strided_slice %272 {offsets = [0, 0], sizes = [8, 64], strides = [1, 1]} : vector<8x96xf32> to vector<8x64xf32>
    %274 = vector.extract_strided_slice %271 {offsets = [0, 0], sizes = [8, 64], strides = [1, 1]} : vector<8x96xf32> to vector<8x64xf32>
    %275 = arith.addf %273, %274 : vector<8x64xf32>
    %276 = arith.negf %275 : vector<8x64xf32>
    %277 = math.exp %276 : vector<8x64xf32>
    %cst_40 = arith.constant 1.000000e+00 : f32
    %278 = vector.broadcast %cst_40 : f32 to vector<8x64xf32>
    %279 = arith.addf %278, %277 : vector<8x64xf32>
    %280 = arith.divf %278, %279 : vector<8x64xf32>
    %281 = vector.extract_strided_slice %280 {offsets = [0, 0], sizes = [8, 32], strides = [1, 1]} : vector<8x64xf32> to vector<8x32xf32>
    %282 = vector.extract_strided_slice %280 {offsets = [0, 32], sizes = [8, 32], strides = [1, 1]} : vector<8x64xf32> to vector<8x32xf32>
    %283 = vector.extract_strided_slice %272 {offsets = [0, 64], sizes = [8, 32], strides = [1, 1]} : vector<8x96xf32> to vector<8x32xf32>
    %284 = vector.extract_strided_slice %271 {offsets = [0, 64], sizes = [8, 32], strides = [1, 1]} : vector<8x96xf32> to vector<8x32xf32>
    %285 = arith.mulf %281, %284 : vector<8x32xf32>
    %286 = arith.addf %283, %285 : vector<8x32xf32>
    %287 = math.tanh %286 : vector<8x32xf32>
    %cst_41 = arith.constant 1.000000e+00 : f32
    %288 = vector.broadcast %cst_41 : f32 to vector<8x32xf32>
    %289 = arith.subf %288, %282 : vector<8x32xf32>
    %290 = arith.mulf %289, %287 : vector<8x32xf32>
    %291 = arith.mulf %282, %249 : vector<8x32xf32>
    %292 = arith.addf %290, %291 : vector<8x32xf32>
    %293 = tpu.concatenate %292, %270 in 1 : vector<8x32xf32>, vector<8x32xf32> -> vector<8x64xf32>
    %294 = arith.truncf %293 : vector<8x64xf32> to vector<8x64xbf16>
    %cst_42 = arith.constant dense<0.000000e+00> : vector<8x224xf32>
    %295 = tpu.matmul %294, %10, %cst_42 {dimension_numbers = #tpu.dot_dimension_numbers<[1], [0], [0], [1], [0, 0, 1, 1], [], []>} : vector<8x64xbf16>, vector<64x224xbf16>, vector<8x224xf32> -> vector<8x224xf32>
    %296 = vector.extract_strided_slice %295 {offsets = [0, 0], sizes = [8, 64], strides = [1, 1]} : vector<8x224xf32> to vector<8x64xf32>
    %297 = arith.negf %296 : vector<8x64xf32>
    %298 = math.exp %297 : vector<8x64xf32>
    %cst_43 = arith.constant 1.000000e+00 : f32
    %299 = vector.broadcast %cst_43 : f32 to vector<8x64xf32>
    %300 = arith.addf %299, %298 : vector<8x64xf32>
    %301 = arith.divf %299, %300 : vector<8x64xf32>
    %302 = vector.extract_strided_slice %301 {offsets = [0, 0], sizes = [8, 32], strides = [1, 1]} : vector<8x64xf32> to vector<8x32xf32>
    %303 = vector.extract_strided_slice %301 {offsets = [0, 32], sizes = [8, 32], strides = [1, 1]} : vector<8x64xf32> to vector<8x32xf32>
    %304 = vector.extract_strided_slice %295 {offsets = [0, 64], sizes = [8, 32], strides = [1, 1]} : vector<8x224xf32> to vector<8x32xf32>
    %305 = vector.extract_strided_slice %295 {offsets = [0, 96], sizes = [8, 32], strides = [1, 1]} : vector<8x224xf32> to vector<8x32xf32>
    %306 = arith.mulf %302, %305 : vector<8x32xf32>
    %307 = arith.addf %304, %306 : vector<8x32xf32>
    %308 = math.tanh %307 : vector<8x32xf32>
    %cst_44 = arith.constant 1.000000e+00 : f32
    %309 = vector.broadcast %cst_44 : f32 to vector<8x32xf32>
    %310 = arith.subf %309, %303 : vector<8x32xf32>
    %311 = arith.mulf %310, %308 : vector<8x32xf32>
    %312 = arith.mulf %303, %270 : vector<8x32xf32>
    %313 = arith.addf %311, %312 : vector<8x32xf32>
    %314 = vector.extract_strided_slice %295 {offsets = [0, 128], sizes = [8, 96], strides = [1, 1]} : vector<8x224xf32> to vector<8x96xf32>
    %315 = vector.extract_strided_slice %9 {offsets = [56, 0], sizes = [8, 96], strides = [1, 1]} : vector<64x96xf32> to vector<8x96xf32>
    %316 = vector.extract_strided_slice %315 {offsets = [0, 0], sizes = [8, 64], strides = [1, 1]} : vector<8x96xf32> to vector<8x64xf32>
    %317 = vector.extract_strided_slice %314 {offsets = [0, 0], sizes = [8, 64], strides = [1, 1]} : vector<8x96xf32> to vector<8x64xf32>
    %318 = arith.addf %316, %317 : vector<8x64xf32>
    %319 = arith.negf %318 : vector<8x64xf32>
    %320 = math.exp %319 : vector<8x64xf32>
    %cst_45 = arith.constant 1.000000e+00 : f32
    %321 = vector.broadcast %cst_45 : f32 to vector<8x64xf32>
    %322 = arith.addf %321, %320 : vector<8x64xf32>
    %323 = arith.divf %321, %322 : vector<8x64xf32>
    %324 = vector.extract_strided_slice %323 {offsets = [0, 0], sizes = [8, 32], strides = [1, 1]} : vector<8x64xf32> to vector<8x32xf32>
    %325 = vector.extract_strided_slice %323 {offsets = [0, 32], sizes = [8, 32], strides = [1, 1]} : vector<8x64xf32> to vector<8x32xf32>
    %326 = vector.extract_strided_slice %315 {offsets = [0, 64], sizes = [8, 32], strides = [1, 1]} : vector<8x96xf32> to vector<8x32xf32>
    %327 = vector.extract_strided_slice %314 {offsets = [0, 64], sizes = [8, 32], strides = [1, 1]} : vector<8x96xf32> to vector<8x32xf32>
    %328 = arith.mulf %324, %327 : vector<8x32xf32>
    %329 = arith.addf %326, %328 : vector<8x32xf32>
    %330 = math.tanh %329 : vector<8x32xf32>
    %cst_46 = arith.constant 1.000000e+00 : f32
    %331 = vector.broadcast %cst_46 : f32 to vector<8x32xf32>
    %332 = arith.subf %331, %325 : vector<8x32xf32>
    %333 = arith.mulf %332, %330 : vector<8x32xf32>
    %334 = arith.mulf %325, %292 : vector<8x32xf32>
    %335 = arith.addf %333, %334 : vector<8x32xf32>
    %336 = tpu.concatenate %335, %313 in 1 : vector<8x32xf32>, vector<8x32xf32> -> vector<8x64xf32>
    %337 = arith.truncf %336 : vector<8x64xf32> to vector<8x64xbf16>
    %cst_47 = arith.constant dense<0.000000e+00> : vector<8x224xf32>
    %338 = tpu.matmul %337, %10, %cst_47 {dimension_numbers = #tpu.dot_dimension_numbers<[1], [0], [0], [1], [0, 0, 1, 1], [], []>} : vector<8x64xbf16>, vector<64x224xbf16>, vector<8x224xf32> -> vector<8x224xf32>
    %339 = vector.extract_strided_slice %338 {offsets = [0, 0], sizes = [8, 64], strides = [1, 1]} : vector<8x224xf32> to vector<8x64xf32>
    %340 = arith.negf %339 : vector<8x64xf32>
    %341 = math.exp %340 : vector<8x64xf32>
    %cst_48 = arith.constant 1.000000e+00 : f32
    %342 = vector.broadcast %cst_48 : f32 to vector<8x64xf32>
    %343 = arith.addf %342, %341 : vector<8x64xf32>
    %344 = arith.divf %342, %343 : vector<8x64xf32>
    %345 = vector.extract_strided_slice %344 {offsets = [0, 0], sizes = [8, 32], strides = [1, 1]} : vector<8x64xf32> to vector<8x32xf32>
    %346 = vector.extract_strided_slice %344 {offsets = [0, 32], sizes = [8, 32], strides = [1, 1]} : vector<8x64xf32> to vector<8x32xf32>
    %347 = vector.extract_strided_slice %338 {offsets = [0, 64], sizes = [8, 32], strides = [1, 1]} : vector<8x224xf32> to vector<8x32xf32>
    %348 = vector.extract_strided_slice %338 {offsets = [0, 96], sizes = [8, 32], strides = [1, 1]} : vector<8x224xf32> to vector<8x32xf32>
    %349 = arith.mulf %345, %348 : vector<8x32xf32>
    %350 = arith.addf %347, %349 : vector<8x32xf32>
    %351 = math.tanh %350 : vector<8x32xf32>
    %cst_49 = arith.constant 1.000000e+00 : f32
    %352 = vector.broadcast %cst_49 : f32 to vector<8x32xf32>
    %353 = arith.subf %352, %346 : vector<8x32xf32>
    %354 = arith.mulf %353, %351 : vector<8x32xf32>
    %355 = arith.mulf %346, %313 : vector<8x32xf32>
    %356 = arith.addf %354, %355 : vector<8x32xf32>
    %357 = vector.extract_strided_slice %2 {offsets = [0, 0], sizes = [1, 32], strides = [1, 1]} : vector<1x64xf32> to vector<1x32xf32>
    %358 = vector.broadcast %357 : vector<1x32xf32> to vector<8x32xf32>
    %359 = arith.mulf %335, %358 : vector<8x32xf32>
    %360 = vector.extract_strided_slice %2 {offsets = [0, 32], sizes = [1, 32], strides = [1, 1]} : vector<1x64xf32> to vector<1x32xf32>
    %361 = vector.broadcast %360 : vector<1x32xf32> to vector<8x32xf32>
    %362 = arith.mulf %356, %361 : vector<8x32xf32>
    %363 = arith.addf %359, %362 : vector<8x32xf32>
    %cst_50 = arith.constant dense<0.000000e+00> : vector<8xf32>
    %364 = vector.multi_reduction <add>, %363, %cst_50 [1] : vector<8x32xf32> to vector<8xf32>
    %365 = vector.shape_cast %364 : vector<8xf32> to vector<8x1xf32>
    %366 = vector.broadcast %3 : vector<1x1xf32> to vector<8x1xf32>
    %367 = arith.addf %365, %366 : vector<8x1xf32>
    %c0_51 = arith.constant 0 : index
    %c0_52 = arith.constant 0 : index
    %368 = vector.load %arg3[%c0_51, %c0_52] : memref<8x1xf32, #tpu.memory_space<vmem>>, vector<8x1xf32>
    tpu.vector_store %arg3[%c0_51, %c0_52], %367 {strides = array<i32>} : memref<8x1xf32, #tpu.memory_space<vmem>>, vector<8x1xf32>,
    return
  }
}

</mosaic_0001>

<bundles_post_ra>
// kernel: tpu_custom_call.1
= control target key start
LH: loop header
LB: loop body
LE: loop exit
PB: predicated region body
PF: predicated region fallthrough
CT: control target
= control target key end

     0   :  { %8 = vsyncpa [#allocation3], 0  ;;  %s1259_s15 = smov [#allocation2]   ;;  %s1601_s0 = inlined_call_operand.vmem [shape: f32[64,1], index: 0, kind: input, shape index: {}]   ;;  %s1602_s1 = inlined_call_operand.hbm [shape: f32[8,128], index: 1, kind: input, shape index: {}]   ;;  %s1603_s2 = inlined_call_operand.vmem [shape: bf16[64,224], index: 2, kind: input, shape index: {}]   ;;  %s1604_s3 = inlined_call_operand.vmem [shape: f32[8,1], index: 3, kind: output, shape index: {}]  }
   0x1   :  { %s16_s14 = sshll.u32 %s1602_s1, 4  ;;  %s18_s16 = sshll.u32 %s1259_s15, 4  ;;  %s17_s14 = int_to_ptr.hbm [resolvable:$true] %s16_s14  ;;  %s19_s16 = int_to_ptr.vmem [resolvable:$true] %s18_s16 }
   0x2   :  { %21 = dma.hbm_to_vmem [thread:$0]  %s17_s14, 128, %s19_s16, [#allocation3]  }
   0x3   :  { %1257 = dma.done.wait [#allocation3], 128  }
   0x4   :  { %1258 = vsyncadd [#allocation3], 4294967168  ;;  %v1260_v0 = vmov 0   ;;  %v32_v1 = vld [vmem:[%s1601_s0] sm:$0xff]  ;;  %s1261_s1 = smov 64   ;;  %s1262_s19 = smov 96  }
   0x5   :  { %1129 = vset.pattern.permute.xlu0 %v1260_v0  ;;  %1130 = vset.pattern.permute.xlu2 %v1260_v0  ;;  %v1290_v2 = vld [vmem:[#allocation2] ss:$0 sm:$0xff]  ;;  %v1292_v3 = vld [vmem:[#allocation2 + $0x1] ss:$0 sm:$0xff]  ;;  %v1080_v24 = vld [vmem:[%s1603_s2 + $0x30] sm:$0xf] }
   0x6   :  { %1131 = vset.pattern.permute.xlu1 %v1260_v0  ;;  %42 = vperm.xlu0 %1129, %v32_v1   ;;  %v1123_v25 = vld [vmem:[%s1603_s2 + $0x34] sm:$0xf0]  ;;  %v1122_v26 = vld [vmem:[%s1603_s2 + $0x34] sm:$0xf]  ;;  %v1082_v28 = vld [vmem:[%s1603_s2 + $0x38] sm:$0xf0] }
   0x7   :  { %v1307_v27 = vor.u32 %v1123_v25, %v1080_v24  ;;  %v1072_v29 = vld [vmem:[%s1603_s2 + $0x20] sm:$0xf]  ;;  %v1121_v30 = vld [vmem:[%s1603_s2 + $0x24] sm:$0xf0]  ;;  %v1318_v31 = vor.u32 %v1122_v26, %v1082_v28  ;;  %v1120_v32 = vld [vmem:[%s1603_s2 + $0x24] sm:$0xf] }
   0x8   :  { %v1074_v33 = vld [vmem:[%s1603_s2 + $0x28] sm:$0xf0]  ;;  %v1327_v34 = vor.u32 %v1121_v30, %v1072_v29  ;;  %v1064_v36 = vld [vmem:[%s1603_s2 + $0x10] sm:$0xf]  ;;  %v1119_v37 = vld [vmem:[%s1603_s2 + $0x14] sm:$0xf0] }
   0x9   :  { %195 = vmatpush.bf16.msra.mxu0 %v1307_v27  ;;  %307 = vmatpush.bf16.msra.mxu2 %v1307_v27  ;;  %v1331_v35 = vor.u32 %v1120_v32, %v1074_v33  ;;  %v1118_v38 = vld [vmem:[%s1603_s2 + $0x14] sm:$0xf]  ;;  %v1066_v39 = vld [vmem:[%s1603_s2 + $0x18] sm:$0xf0]  ;;  %v1347_v40 = vor.u32 %v1119_v37, %v1064_v36  ;;  %v1056_v46 = vld [vmem:[%s1603_s2] sm:$0xf] }
   0xa   :  { %208 = vmatpush.bf16.msra.mxu1 %v1318_v31  ;;  %320 = vmatpush.bf16.msra.mxu3 %v1318_v31  ;;  %v1351_v41 = vor.u32 %v1118_v38, %v1066_v39  ;;  %v1117_v47 = vld [vmem:[%s1603_s2 + $0x4] sm:$0xf0]  ;;  %v1116_v48 = vld [vmem:[%s1603_s2 + $0x4] sm:$0xf]  ;;  %v1058_v50 = vld [vmem:[%s1603_s2 + $0x8] sm:$0xf0] }
   0xb   :  { %v1371_v49 = vor.u32 %v1117_v47, %v1056_v46  ;;  %v1376_v51 = vor.u32 %v1116_v48, %v1058_v50  ;;  %v33_v52 = vld [vmem:[%s1601_s0 + $0x8] sm:$0xff]  ;;  %vm144_vm4 = vcmask 261120   ;;  %vm187_vm5 = vcmask 523264   ;;  %s1263_s2 = smov 32  }
   0xc   :  { %47 = vperm.xlu2 %1130, %v33_v52  }
   0xd   :  { %196 = vmatpush.bf16.msra.mxu0 %v1327_v34  ;;  %308 = vmatpush.bf16.msra.mxu2 %v1327_v34 }
   0xe   :  { %209 = vmatpush.bf16.msra.mxu1 %v1331_v35  ;;  %321 = vmatpush.bf16.msra.mxu3 %v1331_v35 }
  0x11   :  { %197 = vmatpush.bf16.msra.mxu0 %v1347_v40  ;;  %309 = vmatpush.bf16.msra.mxu2 %v1347_v40 }
  0x12   :  { %210 = vmatpush.bf16.msra.mxu1 %v1351_v41  ;;  %322 = vmatpush.bf16.msra.mxu3 %v1351_v41 }
  0x15   :  { %198 = vmatpush.bf16.msra.mxu0 %v1371_v49  ;;  %310 = vmatpush.bf16.msra.mxu2 %v1371_v49 }
  0x16   :  { %211 = vmatpush.bf16.msra.mxu1 %v1376_v51  ;;  %323 = vmatpush.bf16.msra.mxu3 %v1376_v51 }
  0x19   :  { %419 = vmatpush.bf16.msrb.mxu0 %v1307_v27  ;;  %531 = vmatpush.bf16.msrb.mxu2 %v1307_v27 }
  0x1a   :  { %432 = vmatpush.bf16.msrb.mxu1 %v1318_v31  ;;  %544 = vmatpush.bf16.msrb.mxu3 %v1318_v31 }
  0x1d   :  { %420 = vmatpush.bf16.msrb.mxu0 %v1327_v34  ;;  %532 = vmatpush.bf16.msrb.mxu2 %v1327_v34 }
  0x1e   :  { %433 = vmatpush.bf16.msrb.mxu1 %v1331_v35  ;;  %545 = vmatpush.bf16.msrb.mxu3 %v1331_v35 }
  0x21   :  { %421 = vmatpush.bf16.msrb.mxu0 %v1347_v40  ;;  %533 = vmatpush.bf16.msrb.mxu2 %v1347_v40 }
  0x22   :  { %434 = vmatpush.bf16.msrb.mxu1 %v1351_v41  ;;  %546 = vmatpush.bf16.msrb.mxu3 %v1351_v41 }
  0x25   :  { %422 = vmatpush.bf16.msrb.mxu0 %v1371_v49  ;;  %534 = vmatpush.bf16.msrb.mxu2 %v1371_v49 }
  0x26   :  { %435 = vmatpush.bf16.msrb.mxu1 %v1376_v51  ;;  %547 = vmatpush.bf16.msrb.mxu3 %v1376_v51 }
  0x66   :  { %v48_v60 = vpop.permute.xlu2 %47 }
  0x67   :  { %v82_v61 = vmul.f32 %v1290_v2, %v48_v60 }
  0x69   :  { %v91_v62 = vadd.f32 %v1292_v3, %v82_v61 }
  0x78   :  { %v43_v4 = vpop.permute.xlu0 %42 }
  0x79   :  { %v81_v5 = vmul.f32 %v1290_v2, %v43_v4 }
  0x7b   :  { %v90_v6 = vadd.f32 %v1292_v3, %v81_v5 }
  0x7d   :  { %v1053_v7 = vmul.f32 -1.442695, %v90_v6 }
  0x7f   :  { %1135 = vpow2.f32 %v1053_v7 }
  0x85   :  { %v1136_v8 = vpop.eup %1135 }
  0x86   :  { %v110_v9 = vadd.f32 1.0, %v1136_v8 }
  0x88   :  { %1137 = vrcp.f32 %v110_v9  ;;  %v122_v13 = vand.u32 2147483648, %v110_v9  ;;  %v120_v15 = vand.u32 2147483647, %v110_v9  ;;  %vm116_vm1 = vweird.f32 %v110_v9 }
  0x8a   :  { %v123_v17 = vor.u32 1.1754944e-38, %v122_v13  ;;  %vm121_vm3 = vcmp.eq.f32.partialorder %v120_v15, 8.507059e+37 }
  0x8e   :  { %v1138_v10 = vpop.eup %1137 }
  0x8f   :  { %v112_v11 = vmul.f32 %v1138_v10, %v110_v9  ;;  %vm117_vm0 = vweird.f32 %v1138_v10 }
  0x90   :  { %vm118_vm2 = vmor %vm116_vm1, %vm117_vm0 }
  0x91   :  { %v113_v12 = vsub.f32 1.0, %v112_v11 }
  0x93   :  { %v114_v14 = vmul.f32 %v1138_v10, %v113_v12 }
  0x95   :  { %v115_v16 = vadd.f32 %v1138_v10, %v114_v14 }
  0x97   :  { %v119_v18 = vsel %vm118_vm2, %v1138_v10, %v115_v16 }
  0x98   :  { %v124_v19 = vsel %vm121_vm3, %v123_v17, %v119_v18 }
  0x99   :  { %v126_v20 = vmul.f32 0.0, %v124_v19  ;;  %v133_v42 = vsub.f32 1.0, %v124_v19 }
  0x9b   :  { %128 = vrot.lane.b32.xlu0 %v126_v20, %s1261_s1 }
 0x10d   :  { %v129_v21 = vpop.permute.xlu0 %128 }
 0x10e   :  { %v131_v22 = vadd.f32 %v129_v21, %v90_v6 }
 0x110   :  { %1139 = vtanh.f32 %v131_v22 }
 0x116   :  { %v1140_v23 = vpop.eup %1139 }
 0x117   :  { %135 = vrot.lane.b32.xlu1 %v1140_v23, %s1262_s19 }
 0x189   :  { %v136_v43 = vpop.permute.xlu1 %135 }
 0x18a   :  { %v138_v44 = vmul.f32 %v136_v43, %v133_v42 }
 0x18c   :  { %v1358_v45 = vadd.f32 %v138_v44, %v126_v20  ;;  %v34_v44 = vld [vmem:[%s1601_s0 + $0x10] sm:$0xff] }
 0x18e   :  { %141 = vrot.lane.b32.xlu1 %v1358_v45, %s1262_s19 }
 0x200   :  { %v142_v53 = vpop.permute.xlu1 %141 }
 0x201   :  { %v145_v54 = vsel %vm144_vm4, %v142_v53, 0.0 }
 0x202   :  { %v146_v55 = vpack.c.bf16 %v145_v54, %v145_v54 }
 0x204   :  { %1086 = vmatmul.msk.bf16.vlgmr.msra.gmra.mxu0 %vm187_vm5, %v146_v55  ;;  %1087 = vmatmul.msk.bf16.vlgmr.msra.gmra.mxu1 %vm187_vm5, %v146_v55 }
 0x205   :  { %656 = vmatpush.bf16.msra.mxu1 %v1318_v31  ;;  %643 = vmatpush.bf16.msra.mxu0 %v1307_v27 }
 0x209   :  { %657 = vmatpush.bf16.msra.mxu1 %v1331_v35  ;;  %644 = vmatpush.bf16.msra.mxu0 %v1327_v34 }
 0x20d   :  { %658 = vmatpush.bf16.msra.mxu1 %v1351_v41  ;;  %645 = vmatpush.bf16.msra.mxu0 %v1347_v40 }
 0x211   :  { %659 = vmatpush.bf16.msra.mxu1 %v1376_v51  ;;  %646 = vmatpush.bf16.msra.mxu0 %v1371_v49 }
 0x281   :  { %v200_v56 = vpop.f32.mrf.mxu0  ;;  %v213_v57 = vpop.f32.mrf.mxu1 }
 0x282   :  { %276 = vrot.lane.b32.xlu2 %v213_v57, %s1261_s1  ;;  %237 = vrot.lane.b32.xlu0 %v200_v56, %s1263_s2  ;;  %v255_v63 = vadd.f32 %v213_v57, %v91_v62  ;;  %v1088_v6 = vmul.f32 -1.442695, %v200_v56 }
 0x284   :  { %v1089_v0 = vmul.f32 -1.442695, %v255_v63 }
 0x286   :  { %1141 = vpow2.f32 %v1089_v0 }
 0x289   :  { %v202_v58 = vpop.f32.mrf.mxu0  ;;  %v215_v59 = vpop.f32.mrf.mxu1 }
 0x28c   :  { %v1142_v1 = vpop.eup %1141 }
 0x28d   :  { %v259_v4 = vadd.f32 1.0, %v1142_v1 }
 0x28f   :  { %1143 = vrcp.f32 %v259_v4  ;;  %v271_v13 = vand.u32 2147483648, %v259_v4  ;;  %vm265_vm7 = vweird.f32 %v259_v4  ;;  %v269_v14 = vand.u32 2147483647, %v259_v4 }
 0x290   :  { %1145 = vpow2.f32 %v1088_v6 }
 0x291   :  { %v272_v16 = vor.u32 1.1754944e-38, %v271_v13  ;;  %vm270_vm9 = vcmp.eq.f32.partialorder %v269_v14, 8.507059e+37 }
 0x295   :  { %v1144_v5 = vpop.eup %1143 }
 0x296   :  { %v261_v7 = vmul.f32 %v1144_v5, %v259_v4  ;;  %v1146_v9 = vpop.eup %1145  ;;  %vm266_vm6 = vweird.f32 %v1144_v5 }
 0x297   :  { %v220_v11 = vadd.f32 1.0, %v1146_v9  ;;  %vm267_vm8 = vmor %vm265_vm7, %vm266_vm6 }
 0x298   :  { %v262_v8 = vsub.f32 1.0, %v261_v7 }
 0x299   :  { %1147 = vrcp.f32 %v220_v11  ;;  %v232_v25 = vand.u32 2147483648, %v220_v11  ;;  %vm226_vm11 = vweird.f32 %v220_v11  ;;  %v230_v26 = vand.u32 2147483647, %v220_v11 }
 0x29a   :  { %v263_v10 = vmul.f32 %v1144_v5, %v262_v8 }
 0x29b   :  { %v233_v29 = vor.u32 1.1754944e-38, %v232_v25  ;;  %vm231_vm13 = vcmp.eq.f32.partialorder %v230_v26, 8.507059e+37 }
 0x29c   :  { %v264_v12 = vadd.f32 %v1144_v5, %v263_v10 }
 0x29e   :  { %v268_v15 = vsel %vm267_vm8, %v1144_v5, %v264_v12 }
 0x29f   :  { %v273_v18 = vsel %vm270_vm9, %v272_v16, %v268_v15  ;;  %v1148_v20 = vpop.eup %1147 }
 0x2a0   :  { %v222_v21 = vmul.f32 %v1148_v20, %v220_v11  ;;  %vm227_vm10 = vweird.f32 %v1148_v20  ;;  %v286_v46 = vsub.f32 1.0, %v273_v18  ;;  %v292_v48 = vmul.f32 %v273_v18, %v1358_v45 }
 0x2a1   :  { %vm228_vm12 = vmor %vm226_vm11, %vm227_vm10 }
 0x2a2   :  { %v223_v22 = vsub.f32 1.0, %v222_v21 }
 0x2a4   :  { %v224_v23 = vmul.f32 %v1148_v20, %v223_v22 }
 0x2a6   :  { %v225_v24 = vadd.f32 %v1148_v20, %v224_v23 }
 0x2a8   :  { %v229_v28 = vsel %vm228_vm12, %v1148_v20, %v225_v24 }
 0x2a9   :  { %v234_v32 = vsel %vm231_vm13, %v233_v29, %v229_v28 }
 0x2aa   :  { %v247_v54 = vsub.f32 1.0, %v234_v32 }
 0x2dc   :  { %v277_v17 = vpop.permute.xlu2 %276 }
 0x2dd   :  { %v279_v19 = vmul.f32 %v277_v17, %v273_v18 }
 0x2df   :  { %281 = vrot.lane.b32.xlu1 %v279_v19, %s1261_s1 }
 0x2f4   :  { %v238_v30 = vpop.permute.xlu0 %237 }
 0x2f5   :  { %v240_v33 = vmul.f32 %v238_v30, %v234_v32 }
 0x2f7   :  { %242 = vrot.lane.b32.xlu2 %v240_v33, %s1261_s1 }
 0x351   :  { %v282_v36 = vpop.permute.xlu1 %281  ;;  %v243_v37 = vpop.permute.xlu2 %242 }
 0x352   :  { %v284_v38 = vadd.f32 %v282_v36, %v91_v62  ;;  %v245_v39 = vadd.f32 %v243_v37, %v200_v56  ;;  %v253_v56 = vmul.f32 0.0, %v234_v32 }
 0x354   :  { %1149 = vtanh.f32 %v284_v38 }
 0x355   :  { %1151 = vtanh.f32 %v245_v39 }
 0x35a   :  { %v1150_v42 = vpop.eup %1149 }
 0x35b   :  { %v1152_v43 = vpop.eup %1151  ;;  %288 = vrot.lane.b32.xlu0 %v1150_v42, %s1262_s19 }
 0x35c   :  { %249 = vrot.lane.b32.xlu1 %v1152_v43, %s1262_s19 }
 0x363   :  { %52 = vperm.xlu0 %1129, %v34_v44  }
 0x3cd   :  { %v289_v47 = vpop.permute.xlu0 %288 }
 0x3ce   :  { %v291_v50 = vmul.f32 %v289_v47, %v286_v46  ;;  %v250_v53 = vpop.permute.xlu1 %249 }
 0x3cf   :  { %v252_v55 = vmul.f32 %v250_v53, %v247_v54 }
 0x3d0   :  { %v1424_v52 = vadd.f32 %v292_v48, %v291_v50  ;;  %v35_v50 = vld [vmem:[%s1601_s0 + $0x18] sm:$0xff] }
 0x3d1   :  { %v1428_v57 = vadd.f32 %v253_v56, %v252_v55 }
 0x3d2   :  { %295 = vrot.lane.b32.xlu2 %v1424_v52, %s1262_s19 }
 0x3d5   :  { %v53_v4 = vpop.permute.xlu0 %52 }
 0x3d6   :  { %v83_v6 = vmul.f32 %v1290_v2, %v53_v4 }
 0x3d8   :  { %v92_v7 = vadd.f32 %v1292_v3, %v83_v6 }
 0x42c   :  { %v296_v58 = vpop.permute.xlu2 %295 }
 0x42d   :  { %v298_v59 = vsel %vm144_vm4, %v296_v58, %v1428_v57 }
 0x42e   :  { %v299_v60 = vpack.c.bf16 %v298_v59, %v298_v59 }
 0x430   :  { %1090 = vmatmul.msk.bf16.vlgmr.msra.gmra.mxu2 %vm187_vm5, %v299_v60  ;;  %1091 = vmatmul.msk.bf16.vlgmr.msra.gmra.mxu3 %vm187_vm5, %v299_v60 }
 0x431   :  { %768 = vmatpush.bf16.msra.mxu3 %v1318_v31  ;;  %755 = vmatpush.bf16.msra.mxu2 %v1307_v27 }
 0x435   :  { %769 = vmatpush.bf16.msra.mxu3 %v1331_v35  ;;  %756 = vmatpush.bf16.msra.mxu2 %v1327_v34 }
 0x439   :  { %770 = vmatpush.bf16.msra.mxu3 %v1351_v41  ;;  %757 = vmatpush.bf16.msra.mxu2 %v1347_v40 }
 0x43d   :  { %771 = vmatpush.bf16.msra.mxu3 %v1376_v51  ;;  %758 = vmatpush.bf16.msra.mxu2 %v1371_v49 }
 0x4b3   :  { %v312_v45 = vpop.f32.mrf.mxu2  ;;  %v325_v61 = vpop.f32.mrf.mxu3 }
 0x4b4   :  { %388 = vrot.lane.b32.xlu1 %v325_v61, %s1261_s1  ;;  %349 = vrot.lane.b32.xlu2 %v312_v45, %s1263_s2  ;;  %v1092_v0 = vmul.f32 -1.442695, %v312_v45  ;;  %v367_v8 = vadd.f32 %v325_v61, %v92_v7 }
 0x4b6   :  { %1153 = vpow2.f32 %v1092_v0  ;;  %v1093_v10 = vmul.f32 -1.442695, %v367_v8 }
 0x4bb   :  { %v314_v62 = vpop.f32.mrf.mxu2  ;;  %v327_v63 = vpop.f32.mrf.mxu3 }
 0x4bc   :  { %v1154_v1 = vpop.eup %1153 }
 0x4bd   :  { %v332_v5 = vadd.f32 1.0, %v1154_v1 }
 0x4bf   :  { %1155 = vrcp.f32 %v332_v5  ;;  %v344_v17 = vand.u32 2147483648, %v332_v5  ;;  %vm338_vm15 = vweird.f32 %v332_v5  ;;  %v342_v18 = vand.u32 2147483647, %v332_v5 }
 0x4c0   :  { %1157 = vpow2.f32 %v1093_v10 }
 0x4c1   :  { %v345_v20 = vor.u32 1.1754944e-38, %v344_v17  ;;  %vm343_vm1 = vcmp.eq.f32.partialorder %v342_v18, 8.507059e+37 }
 0x4c5   :  { %v1156_v9 = vpop.eup %1155 }
 0x4c6   :  { %v334_v11 = vmul.f32 %v1156_v9, %v332_v5  ;;  %v1158_v13 = vpop.eup %1157  ;;  %vm339_vm14 = vweird.f32 %v1156_v9 }
 0x4c7   :  { %v371_v15 = vadd.f32 1.0, %v1158_v13  ;;  %vm340_vm0 = vmor %vm338_vm15, %vm339_vm14 }
 0x4c8   :  { %v335_v12 = vsub.f32 1.0, %v334_v11 }
 0x4c9   :  { %1159 = vrcp.f32 %v371_v15  ;;  %v383_v30 = vand.u32 2147483648, %v371_v15  ;;  %vm377_vm3 = vweird.f32 %v371_v15  ;;  %v381_v32 = vand.u32 2147483647, %v371_v15 }
 0x4ca   :  { %v336_v14 = vmul.f32 %v1156_v9, %v335_v12 }
 0x4cb   :  { %v384_v36 = vor.u32 1.1754944e-38, %v383_v30  ;;  %vm382_vm7 = vcmp.eq.f32.partialorder %v381_v32, 8.507059e+37 }
 0x4cc   :  { %v337_v16 = vadd.f32 %v1156_v9, %v336_v14 }
 0x4ce   :  { %v341_v19 = vsel %vm340_vm0, %v1156_v9, %v337_v16 }
 0x4cf   :  { %v346_v22 = vsel %vm343_vm1, %v345_v20, %v341_v19  ;;  %v1160_v24 = vpop.eup %1159 }
 0x4d0   :  { %v373_v25 = vmul.f32 %v1160_v24, %v371_v15  ;;  %vm378_vm2 = vweird.f32 %v1160_v24  ;;  %v359_v60 = vsub.f32 1.0, %v346_v22  ;;  %v365_v61 = vmul.f32 %v346_v22, %v1428_v57 }
 0x4d1   :  { %vm379_vm6 = vmor %vm377_vm3, %vm378_vm2 }
 0x4d2   :  { %v374_v26 = vsub.f32 1.0, %v373_v25 }
 0x4d4   :  { %v375_v28 = vmul.f32 %v1160_v24, %v374_v26 }
 0x4d6   :  { %v376_v29 = vadd.f32 %v1160_v24, %v375_v28 }
 0x4d8   :  { %v380_v33 = vsel %vm379_vm6, %v1160_v24, %v376_v29 }
 0x4d9   :  { %v385_v38 = vsel %vm382_vm7, %v384_v36, %v380_v33 }
 0x4da   :  { %v398_v53 = vsub.f32 1.0, %v385_v38  ;;  %v404_v55 = vmul.f32 %v385_v38, %v1424_v52 }
 0x50e   :  { %v350_v21 = vpop.permute.xlu2 %349 }
 0x50f   :  { %v352_v23 = vmul.f32 %v350_v21, %v346_v22 }
 0x511   :  { %354 = vrot.lane.b32.xlu1 %v352_v23, %s1261_s1 }
 0x526   :  { %v389_v37 = vpop.permute.xlu1 %388 }
 0x527   :  { %v391_v39 = vmul.f32 %v389_v37, %v385_v38 }
 0x529   :  { %393 = vrot.lane.b32.xlu0 %v391_v39, %s1261_s1 }
 0x583   :  { %v355_v42 = vpop.permute.xlu1 %354 }
 0x584   :  { %v357_v43 = vadd.f32 %v355_v42, %v312_v45 }
 0x586   :  { %1161 = vtanh.f32 %v357_v43 }
 0x58c   :  { %v1162_v44 = vpop.eup %1161 }
 0x58d   :  { %361 = vrot.lane.b32.xlu0 %v1162_v44, %s1262_s19 }
 0x59b   :  { %v394_v46 = vpop.permute.xlu0 %393 }
 0x59c   :  { %v396_v47 = vadd.f32 %v394_v46, %v92_v7 }
 0x59e   :  { %1163 = vtanh.f32 %v396_v47 }
 0x5a4   :  { %v1164_v48 = vpop.eup %1163 }
 0x5a5   :  { %400 = vrot.lane.b32.xlu2 %v1164_v48, %s1262_s19 }
 0x5ad   :  { %57 = vperm.xlu2 %1130, %v35_v50  }
 0x5ff   :  { %v401_v54 = vpop.permute.xlu2 %400  ;;  %v362_v59 = vpop.permute.xlu0 %361 }
 0x600   :  { %v403_v56 = vmul.f32 %v401_v54, %v398_v53  ;;  %v364_v45 = vmul.f32 %v362_v59, %v359_v60  ;;  %v36_v59 = vld [vmem:[%s1601_s0 + $0x20] sm:$0xff] }
 0x602   :  { %v1454_v58 = vadd.f32 %v404_v55, %v403_v56  ;;  %v1459_v62 = vadd.f32 %v365_v61, %v364_v45 }
 0x604   :  { %407 = vrot.lane.b32.xlu1 %v1454_v58, %s1262_s19 }
 0x607   :  { %v58_v5 = vpop.permute.xlu2 %57 }
 0x676   :  { %v408_v63 = vpop.permute.xlu1 %407 }
 0x677   :  { %v410_v0 = vsel %vm144_vm4, %v408_v63, %v1459_v62 }
 0x678   :  { %v411_v1 = vpack.c.bf16 %v410_v0, %v410_v0 }
 0x67a   :  { %1094 = vmatmul.msk.bf16.vlgmr.msrb.gmra.mxu0 %vm187_vm5, %v411_v1  ;;  %1095 = vmatmul.msk.bf16.vlgmr.msrb.gmra.mxu1 %vm187_vm5, %v411_v1 }
 0x67b   :  { %880 = vmatpush.bf16.msrb.mxu1 %v1318_v31  ;;  %867 = vmatpush.bf16.msrb.mxu0 %v1307_v27 }
 0x67f   :  { %881 = vmatpush.bf16.msrb.mxu1 %v1331_v35  ;;  %868 = vmatpush.bf16.msrb.mxu0 %v1327_v34  ;;  %v84_v35 = vmul.f32 %v1290_v2, %v58_v5 }
 0x681   :  { %v93_v6 = vadd.f32 %v1292_v3, %v84_v35 }
 0x683   :  { %882 = vmatpush.bf16.msrb.mxu1 %v1351_v41  ;;  %869 = vmatpush.bf16.msrb.mxu0 %v1347_v40 }
 0x687   :  { %883 = vmatpush.bf16.msrb.mxu1 %v1376_v51  ;;  %870 = vmatpush.bf16.msrb.mxu0 %v1371_v49 }
 0x6f7   :  { %v424_v52 = vpop.f32.mrf.mxu0  ;;  %v437_v57 = vpop.f32.mrf.mxu1 }
 0x6f8   :  { %500 = vrot.lane.b32.xlu0 %v437_v57, %s1261_s1  ;;  %461 = vrot.lane.b32.xlu1 %v424_v52, %s1263_s2  ;;  %v479_v41 = vadd.f32 %v437_v57, %v93_v6  ;;  %v1096_v7 = vmul.f32 -1.442695, %v424_v52 }
 0x6fa   :  { %v1097_v8 = vmul.f32 -1.442695, %v479_v41  ;;  %1165 = vpow2.f32 %v1096_v7 }
 0x6fc   :  { %1167 = vpow2.f32 %v1097_v8 }
 0x6ff   :  { %v426_v31 = vpop.f32.mrf.mxu0  ;;  %v439_v4 = vpop.f32.mrf.mxu1 }
 0x700   :  { %v1166_v51 = vpop.eup %1165 }
 0x701   :  { %v444_v10 = vadd.f32 1.0, %v1166_v51 }
 0x702   :  { %v1168_v9 = vpop.eup %1167 }
 0x703   :  { %v483_v11 = vadd.f32 1.0, %v1168_v9  ;;  %1169 = vrcp.f32 %v444_v10  ;;  %vm450_vm10 = vweird.f32 %v444_v10  ;;  %v456_v23 = vand.u32 2147483648, %v444_v10 }
 0x704   :  { %v454_v25 = vand.u32 2147483647, %v444_v10 }
 0x705   :  { %1171 = vrcp.f32 %v483_v11  ;;  %v495_v22 = vand.u32 2147483648, %v483_v11  ;;  %vm489_vm11 = vweird.f32 %v483_v11  ;;  %v493_v24 = vand.u32 2147483647, %v483_v11 }
 0x706   :  { %v457_v30 = vor.u32 1.1754944e-38, %v456_v23  ;;  %vm455_vm15 = vcmp.eq.f32.partialorder %v454_v25, 8.507059e+37 }
 0x707   :  { %v496_v29 = vor.u32 1.1754944e-38, %v495_v22  ;;  %vm494_vm14 = vcmp.eq.f32.partialorder %v493_v24, 8.507059e+37 }
 0x709   :  { %v1170_v12 = vpop.eup %1169 }
 0x70a   :  { %v446_v15 = vmul.f32 %v1170_v12, %v444_v10  ;;  %vm451_vm8 = vweird.f32 %v1170_v12 }
 0x70b   :  { %v1172_v13 = vpop.eup %1171  ;;  %vm452_vm12 = vmor %vm450_vm10, %vm451_vm8 }
 0x70c   :  { %v485_v14 = vmul.f32 %v1172_v13, %v483_v11  ;;  %v447_v17 = vsub.f32 1.0, %v446_v15  ;;  %vm490_vm9 = vweird.f32 %v1172_v13 }
 0x70d   :  { %vm491_vm13 = vmor %vm489_vm11, %vm490_vm9 }
 0x70e   :  { %v486_v16 = vsub.f32 1.0, %v485_v14  ;;  %v448_v19 = vmul.f32 %v1170_v12, %v447_v17 }
 0x710   :  { %v487_v18 = vmul.f32 %v1172_v13, %v486_v16  ;;  %v449_v21 = vadd.f32 %v1170_v12, %v448_v19 }
 0x712   :  { %v488_v20 = vadd.f32 %v1172_v13, %v487_v18  ;;  %v453_v28 = vsel %vm452_vm12, %v1170_v12, %v449_v21 }
 0x713   :  { %v458_v37 = vsel %vm455_vm15, %v457_v30, %v453_v28 }
 0x714   :  { %v492_v26 = vsel %vm491_vm13, %v1172_v13, %v488_v20  ;;  %v471_v45 = vsub.f32 1.0, %v458_v37  ;;  %v477_v63 = vmul.f32 %v458_v37, %v1459_v62 }
 0x715   :  { %v497_v33 = vsel %vm494_vm14, %v496_v29, %v492_v26 }
 0x716   :  { %v510_v50 = vsub.f32 1.0, %v497_v33  ;;  %v516_v54 = vmul.f32 %v497_v33, %v1454_v58 }
 0x76a   :  { %v501_v32 = vpop.permute.xlu0 %500  ;;  %v462_v36 = vpop.permute.xlu1 %461 }
 0x76b   :  { %v503_v38 = vmul.f32 %v501_v32, %v497_v33  ;;  %v464_v39 = vmul.f32 %v462_v36, %v458_v37 }
 0x76d   :  { %505 = vrot.lane.b32.xlu2 %v503_v38, %s1261_s1  ;;  %466 = vrot.lane.b32.xlu0 %v464_v39, %s1261_s1 }
 0x7c7   :  { %v506_v42 = vpop.permute.xlu2 %505 }
 0x7c8   :  { %v508_v43 = vadd.f32 %v506_v42, %v93_v6 }
 0x7ca   :  { %1173 = vtanh.f32 %v508_v43 }
 0x7d0   :  { %v1174_v44 = vpop.eup %1173 }
 0x7d1   :  { %512 = vrot.lane.b32.xlu1 %v1174_v44, %s1262_s19  ;;  %v37_v44 = vld [vmem:[%s1601_s0 + $0x28] sm:$0xff] }
 0x7d9   :  { %62 = vperm.xlu1 %1131, %v36_v59  }
 0x7df   :  { %v467_v46 = vpop.permute.xlu0 %466 }
 0x7e0   :  { %v469_v47 = vadd.f32 %v467_v46, %v424_v52 }
 0x7e2   :  { %1175 = vtanh.f32 %v469_v47 }
 0x7e8   :  { %v1176_v48 = vpop.eup %1175 }
 0x7e9   :  { %473 = vrot.lane.b32.xlu2 %v1176_v48, %s1262_s19 }
 0x843   :  { %v513_v53 = vpop.permute.xlu1 %512  ;;  %v474_v60 = vpop.permute.xlu2 %473 }
 0x844   :  { %v515_v55 = vmul.f32 %v513_v53, %v510_v50  ;;  %v476_v61 = vmul.f32 %v474_v60, %v471_v45 }
 0x846   :  { %v1482_v56 = vadd.f32 %v516_v54, %v515_v55  ;;  %v1490_v0 = vadd.f32 %v477_v63, %v476_v61 }
 0x848   :  { %519 = vrot.lane.b32.xlu0 %v1482_v56, %s1262_s19 }
 0x84b   :  { %v63_v5 = vpop.permute.xlu1 %62 }
 0x84c   :  { %v85_v35 = vmul.f32 %v1290_v2, %v63_v5 }
 0x84e   :  { %v94_v6 = vadd.f32 %v1292_v3, %v85_v35 }
 0x8ba   :  { %v520_v1 = vpop.permute.xlu0 %519 }
 0x8bb   :  { %v522_v58 = vsel %vm144_vm4, %v520_v1, %v1490_v0 }
 0x8bc   :  { %v523_v52 = vpack.c.bf16 %v522_v58, %v522_v58 }
 0x8be   :  { %1098 = vmatmul.msk.bf16.vlgmr.msrb.gmra.mxu2 %vm187_vm5, %v523_v52  ;;  %1099 = vmatmul.msk.bf16.vlgmr.msrb.gmra.mxu3 %vm187_vm5, %v523_v52 }
 0x8bf   :  { %979 = vmatpush.bf16.msrb.mxu2 %v1307_v27 }
 0x8c3   :  { %980 = vmatpush.bf16.msrb.mxu2 %v1327_v34 }
 0x8c7   :  { %981 = vmatpush.bf16.msrb.mxu2 %v1347_v40 }
 0x8cb   :  { %982 = vmatpush.bf16.msrb.mxu2 %v1371_v49 }
 0x941   :  { %v536_v62 = vpop.f32.mrf.mxu2  ;;  %v549_v57 = vpop.f32.mrf.mxu3 }
 0x942   :  { %612 = vrot.lane.b32.xlu2 %v549_v57, %s1261_s1  ;;  %573 = vrot.lane.b32.xlu0 %v536_v62, %s1263_s2  ;;  %v591_v27 = vadd.f32 %v549_v57, %v94_v6  ;;  %v1100_v7 = vmul.f32 -1.442695, %v536_v62 }
 0x944   :  { %v1101_v41 = vmul.f32 -1.442695, %v591_v27 }
 0x946   :  { %1177 = vpow2.f32 %v1101_v41 }
 0x949   :  { %v538_v31 = vpop.f32.mrf.mxu2  ;;  %v551_v4 = vpop.f32.mrf.mxu3 }
 0x94c   :  { %v1178_v34 = vpop.eup %1177 }
 0x94d   :  { %v595_v40 = vadd.f32 1.0, %v1178_v34 }
 0x94f   :  { %1179 = vrcp.f32 %v595_v40  ;;  %v607_v13 = vand.u32 2147483648, %v595_v40  ;;  %vm601_vm1 = vweird.f32 %v595_v40  ;;  %v605_v14 = vand.u32 2147483647, %v595_v40 }
 0x950   :  { %1181 = vpow2.f32 %v1100_v7 }
 0x951   :  { %v608_v16 = vor.u32 1.1754944e-38, %v607_v13  ;;  %vm606_vm3 = vcmp.eq.f32.partialorder %v605_v14, 8.507059e+37 }
 0x955   :  { %v1180_v49 = vpop.eup %1179 }
 0x956   :  { %v597_v8 = vmul.f32 %v1180_v49, %v595_v40  ;;  %v1182_v9 = vpop.eup %1181  ;;  %vm602_vm0 = vweird.f32 %v1180_v49 }
 0x957   :  { %v556_v11 = vadd.f32 1.0, %v1182_v9  ;;  %vm603_vm2 = vmor %vm601_vm1, %vm602_vm0 }
 0x958   :  { %v598_v51 = vsub.f32 1.0, %v597_v8 }
 0x959   :  { %1183 = vrcp.f32 %v556_v11  ;;  %v568_v25 = vand.u32 2147483648, %v556_v11  ;;  %vm562_vm7 = vweird.f32 %v556_v11  ;;  %v566_v26 = vand.u32 2147483647, %v556_v11 }
 0x95a   :  { %v599_v10 = vmul.f32 %v1180_v49, %v598_v51 }
 0x95b   :  { %v569_v29 = vor.u32 1.1754944e-38, %v568_v25  ;;  %vm567_vm9 = vcmp.eq.f32.partialorder %v566_v26, 8.507059e+37 }
 0x95c   :  { %v600_v12 = vadd.f32 %v1180_v49, %v599_v10 }
 0x95e   :  { %v604_v15 = vsel %vm603_vm2, %v1180_v49, %v600_v12 }
 0x95f   :  { %v609_v18 = vsel %vm606_vm3, %v608_v16, %v604_v15  ;;  %v1184_v20 = vpop.eup %1183 }
 0x960   :  { %v558_v21 = vmul.f32 %v1184_v20, %v556_v11  ;;  %vm563_vm6 = vweird.f32 %v1184_v20  ;;  %v622_v46 = vsub.f32 1.0, %v609_v18  ;;  %v628_v48 = vmul.f32 %v609_v18, %v1482_v56 }
 0x961   :  { %vm564_vm8 = vmor %vm562_vm7, %vm563_vm6 }
 0x962   :  { %v559_v22 = vsub.f32 1.0, %v558_v21 }
 0x964   :  { %v560_v23 = vmul.f32 %v1184_v20, %v559_v22 }
 0x966   :  { %v561_v24 = vadd.f32 %v1184_v20, %v560_v23 }
 0x968   :  { %v565_v28 = vsel %vm564_vm8, %v1184_v20, %v561_v24 }
 0x969   :  { %v570_v32 = vsel %vm567_vm9, %v569_v29, %v565_v28 }
 0x96a   :  { %v583_v55 = vsub.f32 1.0, %v570_v32  ;;  %v589_v60 = vmul.f32 %v570_v32, %v1490_v0 }
 0x99c   :  { %v613_v17 = vpop.permute.xlu2 %612 }
 0x99d   :  { %v615_v19 = vmul.f32 %v613_v17, %v609_v18 }
 0x99f   :  { %617 = vrot.lane.b32.xlu1 %v615_v19, %s1261_s1 }
 0x9b4   :  { %v574_v30 = vpop.permute.xlu0 %573 }
 0x9b5   :  { %v576_v33 = vmul.f32 %v574_v30, %v570_v32 }
 0x9b7   :  { %578 = vrot.lane.b32.xlu2 %v576_v33, %s1261_s1 }
 0xa11   :  { %v618_v36 = vpop.permute.xlu1 %617  ;;  %v579_v37 = vpop.permute.xlu2 %578 }
 0xa12   :  { %v620_v38 = vadd.f32 %v618_v36, %v94_v6  ;;  %v581_v39 = vadd.f32 %v579_v37, %v536_v62  ;;  %v38_v36 = vld [vmem:[%s1601_s0 + $0x30] sm:$0xff] }
 0xa14   :  { %1185 = vtanh.f32 %v620_v38 }
 0xa15   :  { %1187 = vtanh.f32 %v581_v39 }
 0xa1a   :  { %v1186_v42 = vpop.eup %1185 }
 0xa1b   :  { %v1188_v43 = vpop.eup %1187  ;;  %624 = vrot.lane.b32.xlu0 %v1186_v42, %s1262_s19 }
 0xa1c   :  { %585 = vrot.lane.b32.xlu1 %v1188_v43, %s1262_s19 }
 0xa23   :  { %67 = vperm.xlu0 %1129, %v37_v44  }
 0xa8d   :  { %v625_v47 = vpop.permute.xlu0 %624 }
 0xa8e   :  { %v627_v50 = vmul.f32 %v625_v47, %v622_v46  ;;  %v586_v54 = vpop.permute.xlu1 %585 }
 0xa8f   :  { %v588_v59 = vmul.f32 %v586_v54, %v583_v55 }
 0xa90   :  { %v1512_v53 = vadd.f32 %v628_v48, %v627_v50 }
 0xa91   :  { %v1517_v45 = vadd.f32 %v589_v60, %v588_v59 }
 0xa92   :  { %631 = vrot.lane.b32.xlu2 %v1512_v53, %s1262_s19 }
 0xa95   :  { %v68_v31 = vpop.permute.xlu0 %67 }
 0xa96   :  { %v86_v5 = vmul.f32 %v1290_v2, %v68_v31 }
 0xa98   :  { %v95_v35 = vadd.f32 %v1292_v3, %v86_v5 }
 0xaec   :  { %v632_v61 = vpop.permute.xlu2 %631 }
 0xaed   :  { %v634_v63 = vsel %vm144_vm4, %v632_v61, %v1517_v45 }
 0xaee   :  { %v635_v1 = vpack.c.bf16 %v634_v63, %v634_v63 }
 0xaf0   :  { %1102 = vmatmul.msk.bf16.vlgmr.msra.gmra.mxu0 %vm187_vm5, %v635_v1  ;;  %1103 = vmatmul.msk.bf16.vlgmr.msra.gmra.mxu1 %vm187_vm5, %v635_v1  ;;  %v1551_v1 = vld [vmem:[#allocation2] ss:$0 sm:$0xff] }
 0xb6d   :  { %v648_v56 = vpop.f32.mrf.mxu0  ;;  %v661_v58 = vpop.f32.mrf.mxu1 }
 0xb6e   :  { %724 = vrot.lane.b32.xlu1 %v661_v58, %s1261_s1  ;;  %685 = vrot.lane.b32.xlu2 %v648_v56, %s1263_s2  ;;  %v1104_v0 = vmul.f32 -1.442695, %v648_v56  ;;  %v703_v6 = vadd.f32 %v661_v58, %v95_v35  ;;  %v1554_v58 = vld [vmem:[#allocation2 + $0x1] ss:$0 sm:$0xff] }
 0xb70   :  { %1189 = vpow2.f32 %v1104_v0  ;;  %v1105_v41 = vmul.f32 -1.442695, %v703_v6 }
 0xb75   :  { %v650_v52 = vpop.f32.mrf.mxu0  ;;  %v663_v62 = vpop.f32.mrf.mxu1 }
 0xb76   :  { %v1190_v57 = vpop.eup %1189 }
 0xb77   :  { %v668_v4 = vadd.f32 1.0, %v1190_v57 }
 0xb79   :  { %1191 = vrcp.f32 %v668_v4  ;;  %v680_v9 = vand.u32 2147483648, %v668_v4  ;;  %vm674_vm11 = vweird.f32 %v668_v4  ;;  %v678_v10 = vand.u32 2147483647, %v668_v4 }
 0xb7a   :  { %1193 = vpow2.f32 %v1105_v41 }
 0xb7b   :  { %v681_v11 = vor.u32 1.1754944e-38, %v680_v9  ;;  %vm679_vm13 = vcmp.eq.f32.partialorder %v678_v10, 8.507059e+37 }
 0xb7f   :  { %v1192_v27 = vpop.eup %1191 }
 0xb80   :  { %v670_v34 = vmul.f32 %v1192_v27, %v668_v4  ;;  %v1194_v49 = vpop.eup %1193  ;;  %vm675_vm10 = vweird.f32 %v1192_v27 }
 0xb81   :  { %v707_v8 = vadd.f32 1.0, %v1194_v49  ;;  %vm676_vm12 = vmor %vm674_vm11, %vm675_vm10 }
 0xb82   :  { %v671_v40 = vsub.f32 1.0, %v670_v34 }
 0xb83   :  { %1195 = vrcp.f32 %v707_v8  ;;  %v719_v19 = vand.u32 2147483648, %v707_v8  ;;  %vm713_vm15 = vweird.f32 %v707_v8  ;;  %v717_v20 = vand.u32 2147483647, %v707_v8 }
 0xb84   :  { %v672_v7 = vmul.f32 %v1192_v27, %v671_v40 }
 0xb85   :  { %v720_v22 = vor.u32 1.1754944e-38, %v719_v19  ;;  %vm718_vm1 = vcmp.eq.f32.partialorder %v717_v20, 8.507059e+37 }
 0xb86   :  { %v673_v51 = vadd.f32 %v1192_v27, %v672_v7 }
 0xb88   :  { %v677_v2 = vsel %vm676_vm12, %v1192_v27, %v673_v51 }
 0xb89   :  { %v682_v12 = vsel %vm679_vm13, %v681_v11, %v677_v2  ;;  %v1196_v14 = vpop.eup %1195 }
 0xb8a   :  { %v709_v15 = vmul.f32 %v1196_v14, %v707_v8  ;;  %vm714_vm14 = vweird.f32 %v1196_v14  ;;  %v695_v46 = vsub.f32 1.0, %v682_v12  ;;  %v701_v48 = vmul.f32 %v682_v12, %v1517_v45 }
 0xb8b   :  { %vm715_vm0 = vmor %vm713_vm15, %vm714_vm14 }
 0xb8c   :  { %v710_v16 = vsub.f32 1.0, %v709_v15 }
 0xb8e   :  { %v711_v17 = vmul.f32 %v1196_v14, %v710_v16 }
 0xb90   :  { %v712_v18 = vadd.f32 %v1196_v14, %v711_v17 }
 0xb92   :  { %v716_v21 = vsel %vm715_vm0, %v1196_v14, %v712_v18 }
 0xb93   :  { %v721_v24 = vsel %vm718_vm1, %v720_v22, %v716_v21 }
 0xb94   :  { %v734_v37 = vsub.f32 1.0, %v721_v24  ;;  %v740_v39 = vmul.f32 %v721_v24, %v1512_v53 }
 0xbc8   :  { %v686_v3 = vpop.permute.xlu2 %685 }
 0xbc9   :  { %v688_v13 = vmul.f32 %v686_v3, %v682_v12 }
 0xbcb   :  { %690 = vrot.lane.b32.xlu1 %v688_v13, %s1261_s1 }
 0xbe0   :  { %v725_v23 = vpop.permute.xlu1 %724 }
 0xbe1   :  { %v727_v25 = vmul.f32 %v725_v23, %v721_v24 }
 0xbe3   :  { %729 = vrot.lane.b32.xlu0 %v727_v25, %s1261_s1  ;;  %v39_v25 = vld [vmem:[%s1601_s0 + $0x38] sm:$0xff] }
 0xc3d   :  { %v691_v26 = vpop.permute.xlu1 %690 }
 0xc3e   :  { %v693_v28 = vadd.f32 %v691_v26, %v648_v56 }
 0xc40   :  { %1197 = vtanh.f32 %v693_v28 }
 0xc46   :  { %v1198_v29 = vpop.eup %1197 }
 0xc47   :  { %697 = vrot.lane.b32.xlu0 %v1198_v29, %s1262_s19 }
 0xc55   :  { %v730_v30 = vpop.permute.xlu0 %729 }
 0xc56   :  { %v732_v32 = vadd.f32 %v730_v30, %v95_v35 }
 0xc58   :  { %1199 = vtanh.f32 %v732_v32 }
 0xc5e   :  { %v1200_v33 = vpop.eup %1199 }
 0xc5f   :  { %736 = vrot.lane.b32.xlu2 %v1200_v33, %s1262_s19 }
 0xc67   :  { %72 = vperm.xlu2 %1130, %v38_v36  }
 0xcb9   :  { %v737_v38 = vpop.permute.xlu2 %736  ;;  %v698_v44 = vpop.permute.xlu0 %697 }
 0xcba   :  { %v739_v42 = vmul.f32 %v737_v38, %v734_v37  ;;  %v700_v47 = vmul.f32 %v698_v44, %v695_v46 }
 0xcbc   :  { %v1535_v43 = vadd.f32 %v740_v39, %v739_v42  ;;  %v1540_v50 = vadd.f32 %v701_v48, %v700_v47 }
 0xcbe   :  { %743 = vrot.lane.b32.xlu1 %v1535_v43, %s1262_s19 }
 0xcc1   :  { %v73_v63 = vpop.permute.xlu2 %72 }
 0xcc2   :  { %v87_v56 = vmul.f32 %v1551_v1, %v73_v63 }
 0xcc4   :  { %v96_v52 = vadd.f32 %v1554_v58, %v87_v56 }
 0xd30   :  { %v744_v54 = vpop.permute.xlu1 %743 }
 0xd31   :  { %v746_v55 = vsel %vm144_vm4, %v744_v54, %v1540_v50 }
 0xd32   :  { %v747_v59 = vpack.c.bf16 %v746_v55, %v746_v55 }
 0xd34   :  { %1106 = vmatmul.msk.bf16.vlgmr.msra.gmra.mxu2 %vm187_vm5, %v747_v59  ;;  %1107 = vmatmul.msk.bf16.vlgmr.msra.gmra.mxu3 %vm187_vm5, %v747_v59 }
 0xdb7   :  { %v1546_v53 = vpop.f32.mrf.mxu2  ;;  %v773_v60 = vpop.f32.mrf.mxu3 }
 0xdb8   :  { %836 = vrot.lane.b32.xlu0 %v773_v60, %s1261_s1  ;;  %797 = vrot.lane.b32.xlu1 %v1546_v53, %s1263_s2  ;;  %v815_v62 = vadd.f32 %v773_v60, %v96_v52  ;;  %v1108_v0 = vmul.f32 -1.442695, %v1546_v53 }
 0xdba   :  { %v1109_v57 = vmul.f32 -1.442695, %v815_v62  ;;  %1201 = vpow2.f32 %v1108_v0 }
 0xdbc   :  { %1203 = vpow2.f32 %v1109_v57 }
 0xdbf   :  { %v762_v45 = vpop.f32.mrf.mxu2  ;;  %v775_v61 = vpop.f32.mrf.mxu3 }
 0xdc0   :  { %v1202_v31 = vpop.eup %1201 }
 0xdc1   :  { %v780_v5 = vadd.f32 1.0, %v1202_v31 }
 0xdc2   :  { %v1204_v4 = vpop.eup %1203 }
 0xdc3   :  { %v819_v35 = vadd.f32 1.0, %v1204_v4  ;;  %1205 = vrcp.f32 %v780_v5  ;;  %vm786_vm6 = vweird.f32 %v780_v5  ;;  %v792_v2 = vand.u32 2147483648, %v780_v5 }
 0xdc4   :  { %v790_v3 = vand.u32 2147483647, %v780_v5 }
 0xdc5   :  { %1207 = vrcp.f32 %v819_v35  ;;  %v831_v10 = vand.u32 2147483648, %v819_v35  ;;  %vm825_vm7 = vweird.f32 %v819_v35  ;;  %v829_v11 = vand.u32 2147483647, %v819_v35 }
 0xdc6   :  { %v793_v15 = vor.u32 1.1754944e-38, %v792_v2  ;;  %vm791_vm11 = vcmp.eq.f32.partialorder %v790_v3, 8.507059e+37 }
 0xdc7   :  { %v832_v14 = vor.u32 1.1754944e-38, %v831_v10  ;;  %vm830_vm10 = vcmp.eq.f32.partialorder %v829_v11, 8.507059e+37 }
 0xdc9   :  { %v1206_v6 = vpop.eup %1205 }
 0xdca   :  { %v782_v34 = vmul.f32 %v1206_v6, %v780_v5  ;;  %vm787_vm2 = vweird.f32 %v1206_v6 }
 0xdcb   :  { %v1208_v27 = vpop.eup %1207  ;;  %vm788_vm8 = vmor %vm786_vm6, %vm787_vm2 }
 0xdcc   :  { %v821_v41 = vmul.f32 %v1208_v27, %v819_v35  ;;  %v783_v49 = vsub.f32 1.0, %v782_v34  ;;  %vm826_vm3 = vweird.f32 %v1208_v27 }
 0xdcd   :  { %vm827_vm9 = vmor %vm825_vm7, %vm826_vm3 }
 0xdce   :  { %v822_v40 = vsub.f32 1.0, %v821_v41  ;;  %v784_v8 = vmul.f32 %v1206_v6, %v783_v49 }
 0xdd0   :  { %v823_v7 = vmul.f32 %v1208_v27, %v822_v40  ;;  %v785_v9 = vadd.f32 %v1206_v6, %v784_v8 }
 0xdd2   :  { %v824_v51 = vadd.f32 %v1208_v27, %v823_v7  ;;  %v789_v13 = vsel %vm788_vm8, %v1206_v6, %v785_v9 }
 0xdd3   :  { %v794_v19 = vsel %vm791_vm11, %v793_v15, %v789_v13 }
 0xdd4   :  { %v828_v12 = vsel %vm827_vm9, %v1208_v27, %v824_v51  ;;  %v807_v39 = vsub.f32 1.0, %v794_v19  ;;  %v813_v44 = vmul.f32 %v794_v19, %v1540_v50  ;;  %vm1046_vm9 = vcmask 7168  }
 0xdd5   :  { %v833_v17 = vsel %vm830_vm10, %v832_v14, %v828_v12 }
 0xdd6   :  { %v846_v30 = vsub.f32 1.0, %v833_v17  ;;  %v852_v33 = vmul.f32 %v833_v17, %v1535_v43 }
 0xe2a   :  { %v837_v16 = vpop.permute.xlu0 %836  ;;  %v798_v18 = vpop.permute.xlu1 %797 }
 0xe2b   :  { %v839_v20 = vmul.f32 %v837_v16, %v833_v17  ;;  %v800_v21 = vmul.f32 %v798_v18, %v794_v19 }
 0xe2d   :  { %841 = vrot.lane.b32.xlu2 %v839_v20, %s1261_s1  ;;  %802 = vrot.lane.b32.xlu0 %v800_v21, %s1261_s1 }
 0xe87   :  { %v842_v22 = vpop.permute.xlu2 %841 }
 0xe88   :  { %v844_v23 = vadd.f32 %v842_v22, %v96_v52 }
 0xe8a   :  { %1209 = vtanh.f32 %v844_v23 }
 0xe90   :  { %v1210_v24 = vpop.eup %1209 }
 0xe91   :  { %848 = vrot.lane.b32.xlu1 %v1210_v24, %s1262_s19 }
 0xe99   :  { %77 = vperm.xlu1 %1131, %v39_v25  }
 0xe9f   :  { %v803_v26 = vpop.permute.xlu0 %802 }
 0xea0   :  { %v805_v28 = vadd.f32 %v803_v26, %v1546_v53 }
 0xea2   :  { %1211 = vtanh.f32 %v805_v28 }
 0xea8   :  { %v1212_v29 = vpop.eup %1211 }
 0xea9   :  { %809 = vrot.lane.b32.xlu2 %v1212_v29, %s1262_s19 }
 0xf03   :  { %v849_v32 = vpop.permute.xlu1 %848  ;;  %v810_v38 = vpop.permute.xlu2 %809 }
 0xf04   :  { %v851_v36 = vmul.f32 %v849_v32, %v846_v30  ;;  %v812_v42 = vmul.f32 %v810_v38, %v807_v39 }
 0xf06   :  { %v1567_v37 = vadd.f32 %v852_v33, %v851_v36  ;;  %v1572_v46 = vadd.f32 %v813_v44, %v812_v42 }
 0xf08   :  { %855 = vrot.lane.b32.xlu0 %v1567_v37, %s1262_s19 }
 0xf0b   :  { %v78_v50 = vpop.permute.xlu1 %77 }
 0xf0c   :  { %v88_v60 = vmul.f32 %v1551_v1, %v78_v50 }
 0xf0e   :  { %v97_v45 = vadd.f32 %v1554_v58, %v88_v60 }
 0xf7a   :  { %v856_v47 = vpop.permute.xlu0 %855 }
 0xf7b   :  { %v858_v48 = vsel %vm144_vm4, %v856_v47, %v1572_v46 }
 0xf7c   :  { %v859_v54 = vpack.c.bf16 %v858_v48, %v858_v48 }
 0xf7e   :  { %1110 = vmatmul.msk.bf16.vlgmr.msrb.gmra.mxu0 %vm187_vm5, %v859_v54  ;;  %1111 = vmatmul.msk.bf16.vlgmr.msrb.gmra.mxu1 %vm187_vm5, %v859_v54 }
 0xffb   :  { %v872_v43 = vpop.f32.mrf.mxu0  ;;  %v885_v55 = vpop.f32.mrf.mxu1 }
 0xffc   :  { %948 = vrot.lane.b32.xlu2 %v885_v55, %s1261_s1  ;;  %909 = vrot.lane.b32.xlu0 %v872_v43, %s1263_s2  ;;  %v927_v61 = vadd.f32 %v885_v55, %v97_v45  ;;  %v1112_v0 = vmul.f32 -1.442695, %v872_v43 }
 0xffe   :  { %v1113_v63 = vmul.f32 -1.442695, %v927_v61 }
0x1000   :  { %1213 = vpow2.f32 %v1113_v63 }
0x1003   :  { %v874_v59 = vpop.f32.mrf.mxu0  ;;  %v887_v53 = vpop.f32.mrf.mxu1 }
0x1006   :  { %v1214_v56 = vpop.eup %1213 }
0x1007   :  { %v931_v52 = vadd.f32 1.0, %v1214_v56 }
0x1009   :  { %1215 = vrcp.f32 %v931_v52  ;;  %v943_v27 = vand.u32 2147483648, %v931_v52  ;;  %vm937_vm13 = vweird.f32 %v931_v52  ;;  %v941_v1 = vand.u32 2147483647, %v931_v52 }
0x100a   :  { %1217 = vpow2.f32 %v1112_v0 }
0x100b   :  { %v944_v41 = vor.u32 1.1754944e-38, %v943_v27  ;;  %vm942_vm15 = vcmp.eq.f32.partialorder %v941_v1, 8.507059e+37 }
0x100f   :  { %v1216_v62 = vpop.eup %1215 }
0x1010   :  { %v933_v57 = vmul.f32 %v1216_v62, %v931_v52  ;;  %v1218_v4 = vpop.eup %1217  ;;  %vm938_vm12 = vweird.f32 %v1216_v62 }
0x1011   :  { %v892_v35 = vadd.f32 1.0, %v1218_v4  ;;  %vm939_vm14 = vmor %vm937_vm13, %vm938_vm12 }
0x1012   :  { %v934_v31 = vsub.f32 1.0, %v933_v57 }
0x1013   :  { %1219 = vrcp.f32 %v892_v35  ;;  %v904_v2 = vand.u32 2147483648, %v892_v35  ;;  %vm898_vm1 = vweird.f32 %v892_v35  ;;  %v902_v11 = vand.u32 2147483647, %v892_v35 }
0x1014   :  { %v935_v5 = vmul.f32 %v1216_v62, %v934_v31 }
0x1015   :  { %v905_v12 = vor.u32 1.1754944e-38, %v904_v2  ;;  %vm903_vm3 = vcmp.eq.f32.partialorder %v902_v11, 8.507059e+37 }
0x1016   :  { %v936_v6 = vadd.f32 %v1216_v62, %v935_v5 }
0x1018   :  { %v940_v58 = vsel %vm939_vm14, %v1216_v62, %v936_v6 }
0x1019   :  { %v945_v40 = vsel %vm942_vm15, %v944_v41, %v940_v58  ;;  %v1220_v7 = vpop.eup %1219 }
0x101a   :  { %v894_v8 = vmul.f32 %v1220_v7, %v892_v35  ;;  %vm899_vm0 = vweird.f32 %v1220_v7  ;;  %v958_v22 = vsub.f32 1.0, %v945_v40  ;;  %v964_v24 = vmul.f32 %v945_v40, %v1567_v37  ;;  %v1134_v37 = vld [vmem:[#allocation2 + $0x2] ss:$0 sm:$0xff] }
0x101b   :  { %vm900_vm2 = vmor %vm898_vm1, %vm899_vm0 }
0x101c   :  { %v895_v51 = vsub.f32 1.0, %v894_v8 }
0x101e   :  { %v896_v9 = vmul.f32 %v1220_v7, %v895_v51 }
0x1020   :  { %v897_v10 = vadd.f32 %v1220_v7, %v896_v9 }
0x1022   :  { %v901_v3 = vsel %vm900_vm2, %v1220_v7, %v897_v10 }
0x1023   :  { %v906_v14 = vsel %vm903_vm3, %v905_v12, %v901_v3 }
0x1024   :  { %v919_v29 = vsub.f32 1.0, %v906_v14  ;;  %v925_v32 = vmul.f32 %v906_v14, %v1572_v46 }
0x1056   :  { %v949_v34 = vpop.permute.xlu2 %948 }
0x1057   :  { %v951_v49 = vmul.f32 %v949_v34, %v945_v40 }
0x1059   :  { %953 = vrot.lane.b32.xlu1 %v951_v49, %s1261_s1 }
0x106e   :  { %v910_v13 = vpop.permute.xlu0 %909 }
0x106f   :  { %v912_v15 = vmul.f32 %v910_v13, %v906_v14 }
0x1071   :  { %914 = vrot.lane.b32.xlu2 %v912_v15, %s1261_s1 }
0x10cb   :  { %v954_v16 = vpop.permute.xlu1 %953  ;;  %v915_v17 = vpop.permute.xlu2 %914 }
0x10cc   :  { %v956_v18 = vadd.f32 %v954_v16, %v97_v45  ;;  %v917_v19 = vadd.f32 %v915_v17, %v872_v43 }
0x10ce   :  { %1221 = vtanh.f32 %v956_v18 }
0x10cf   :  { %1223 = vtanh.f32 %v917_v19 }
0x10d4   :  { %v1222_v20 = vpop.eup %1221 }
0x10d5   :  { %v1224_v21 = vpop.eup %1223  ;;  %960 = vrot.lane.b32.xlu0 %v1222_v20, %s1262_s19 }
0x10d6   :  { %921 = vrot.lane.b32.xlu1 %v1224_v21, %s1262_s19 }
0x1147   :  { %v961_v23 = vpop.permute.xlu0 %960 }
0x1148   :  { %v963_v25 = vmul.f32 %v961_v23, %v958_v22  ;;  %v922_v28 = vpop.permute.xlu1 %921 }
0x1149   :  { %v924_v30 = vmul.f32 %v922_v28, %v919_v29 }
0x114a   :  { %v965_v26 = vadd.f32 %v964_v24, %v963_v25 }
0x114b   :  { %v926_v33 = vadd.f32 %v925_v32, %v924_v30 }
0x114c   :  { %967 = vrot.lane.b32.xlu2 %v965_v26, %s1262_s19 }
0x11a6   :  { %v968_v36 = vpop.permute.xlu2 %967 }
0x11a7   :  { %v970_v38 = vsel %vm144_vm4, %v968_v36, %v926_v33 }
0x11a8   :  { %v971_v39 = vpack.c.bf16 %v970_v38, %v970_v38 }
0x11aa   :  { %1114 = vmatmul.msk.bf16.vlgmr.msrb.gmra.mxu2 %vm187_vm5, %v971_v39 }
0x122d   :  { %v984_v42 = vpop.f32.mrf.mxu2 }
0x122e   :  { %1008 = vrot.lane.b32.xlu0 %v984_v42, %s1263_s2  ;;  %v1115_v47 = vmul.f32 -1.442695, %v984_v42 }
0x1230   :  { %1225 = vpow2.f32 %v1115_v47 }
0x1235   :  { %v986_v44 = vpop.f32.mrf.mxu2 }
0x1236   :  { %1028 = vrot.lane.b32.xlu0 %v1134_v37, %s1263_s2  ;;  %v1226_v48 = vpop.eup %1225 }
0x1237   :  { %v991_v54 = vadd.f32 1.0, %v1226_v48 }
0x1239   :  { %1227 = vrcp.f32 %v991_v54  ;;  %v1003_v50 = vand.u32 2147483648, %v991_v54  ;;  %vm997_vm5 = vweird.f32 %v991_v54  ;;  %v1001_v60 = vand.u32 2147483647, %v991_v54 }
0x123b   :  { %v1004_v61 = vor.u32 1.1754944e-38, %v1003_v50  ;;  %vm1002_vm8 = vcmp.eq.f32.partialorder %v1001_v60, 8.507059e+37 }
0x123f   :  { %v1228_v46 = vpop.eup %1227 }
0x1240   :  { %v993_v43 = vmul.f32 %v1228_v46, %v991_v54  ;;  %vm998_vm6 = vweird.f32 %v1228_v46 }
0x1241   :  { %vm999_vm7 = vmor %vm997_vm5, %vm998_vm6 }
0x1242   :  { %v994_v55 = vsub.f32 1.0, %v993_v43 }
0x1244   :  { %v995_v59 = vmul.f32 %v1228_v46, %v994_v55 }
0x1246   :  { %v996_v53 = vadd.f32 %v1228_v46, %v995_v59 }
0x1248   :  { %v1000_v45 = vsel %vm999_vm7, %v1228_v46, %v996_v53 }
0x1249   :  { %v1005_v56 = vsel %vm1002_vm8, %v1004_v61, %v1000_v45 }
0x124a   :  { %v1018_v31 = vsub.f32 1.0, %v1005_v56  ;;  %v1024_v5 = vmul.f32 %v1005_v56, %v926_v33 }
0x12a0   :  { %v1009_v63 = vpop.permute.xlu0 %1008 }
0x12a1   :  { %v1011_v52 = vmul.f32 %v1009_v63, %v1005_v56 }
0x12a3   :  { %1013 = vrot.lane.b32.xlu1 %v1011_v52, %s1261_s1 }
0x12a8   :  { %v1029_v6 = vpop.permute.xlu0 %1028 }
0x12a9   :  { %v1031_v1 = vmul.f32 %v1029_v6, %v965_v26 }
0x1315   :  { %v1014_v62 = vpop.permute.xlu1 %1013 }
0x1316   :  { %v1016_v0 = vadd.f32 %v1014_v62, %v984_v42 }
0x1318   :  { %1229 = vtanh.f32 %v1016_v0 }
0x131e   :  { %v1230_v57 = vpop.eup %1229 }
0x131f   :  { %1020 = vrot.lane.b32.xlu2 %v1230_v57, %s1262_s19 }
0x1379   :  { %v1021_v4 = vpop.permute.xlu2 %1020 }
0x137a   :  { %v1023_v35 = vmul.f32 %v1021_v4, %v1018_v31 }
0x137c   :  { %v1025_v27 = vadd.f32 %v1024_v5, %v1023_v35 }
0x137e   :  { %v1032_v58 = vmul.f32 %v1134_v37, %v1025_v27 }
0x1380   :  { %v1033_v41 = vadd.f32 %v1032_v58, %v1031_v1 }
0x1382   :  { %1035 = vrot.lane.b32.xlu1 %v1033_v41, %s1262_s19 }
0x13f4   :  { %v1036_v34 = vpop.permute.xlu1 %1035 }
0x13f5   :  { %v1038_v40 = vsel %vm144_vm4, %v1036_v34, 0.0 }
0x13f6   :  { %1039 = vadd.xlane.f32.xlu2 %v1038_v40 }
0x1469   :  { %v1040_v49 = vpop.xlane.xlu2 %1039 }
0x146a   :  { %v1041_v7 = vadd.f32 %v1134_v37, %v1040_v49 }
0x146c   :  { %1043 = vrot.lane.b32.xlu0 %v1041_v7, %s1261_s1 }
0x14de   :  { %v1044_v8 = vpop.permute.xlu0 %1043 }
0x14df   :  { %1047 = vst.msk [vmem:[%s1604_s3] sm:$0xff] %vm1046_vm9, %v1044_v8 }
0x14e0   :  { %1052 = vsyncpa [#allocation3], 1 }

</bundles_post_ra>
